<compile_context>
chip_gen: v7x
topology: tpu7x:2x2x1
jax: 0.10.0
libtpu: 0.0.40
codegen_flags: <defaults>
</compile_context>

<pallas_src>
import functools

import jax
import jax.numpy as jnp
import numpy as np
from jax.experimental import pallas as pl
from jax.experimental.pallas import tpu as pltpu


# ----------------------------- Pallas kernel --------------------------------

def _make_group_kernel(attn_depth: int, num_heads: int, batch: int, seq: int,
                       embed: int):
    """One grid step = full encoder stack (attn_depth pre-LN MHA blocks) for one group."""
    D, H, B, S, E = attn_depth, num_heads, batch, seq, embed
    BS = S * B   # flattened token-major rows; CLS tokens are rows [0, B)

    def kernel(x_ref, bias_ref, hmask_ref, g_ref, be_ref,
               wq_ref, wk_ref, wv_ref, bq_ref, bk_ref, bv_ref,
               wo_ref, bo_ref, o_ref):
        # x_ref:     (1, BS, E)   cls+pos embeddings, token-major flattened
        # bias_ref:  (BS, BS)     0 for same-sample pairs, -1e30 otherwise
        # hmask_ref: (H, E)       per-head lane masks (1.0 inside the head's columns)
        # g/be:      (1, D, 1, E) LayerNorm gamma / beta
        # wq/wk/wv:  (1, D, E, E) projections (1/sqrt(head_dim) already folded into wq)
        # bq/bk/bv:  (1, D, 1, E)
        # wo:        (1, D, E, E) out projection, bo: (1, D, 1, E)
        # o_ref:     (1, B, E)    CLS rows only

        h = x_ref[0]             # (BS, E) resident hidden state
        bias = bias_ref[...]     # (BS, BS)  hoisted out of the depth/head loops
        hmask = hmask_ref[...]   # (H, E)

        # Static depth loop: D is small, all weights already resident in VMEM,
        # every ref index below is a static slice.
        for d in range(D):
            gamma = g_ref[0, d]      # (1, E)
            beta = be_ref[0, d]      # (1, E)
            wq = wq_ref[0, d]        # (E, E)
            wk = wk_ref[0, d]
            wv = wv_ref[0, d]
            bq = bq_ref[0, d]        # (1, E)
            bk = bk_ref[0, d]
            bv = bv_ref[0, d]
            wo = wo_ref[0, d]        # (E, E)
            bo = bo_ref[0, d]        # (1, E)

            # Pre-LayerNorm over the full (BS, E) slab (eps = 1e-5, torch default).
            mean = jnp.mean(h, axis=-1, keepdims=True)
            cen = h - mean
            var = jnp.mean(cen * cen, axis=-1, keepdims=True)
            norm = cen * jax.lax.rsqrt(var + 1e-5) * gamma + beta

            # Q/K/V projections: (BS, E) x (E, E) MXU matmuls (scale folded into wq).
            q = jnp.dot(norm, wq, preferred_element_type=jnp.float32) + bq
            k = jnp.dot(norm, wk, preferred_element_type=jnp.float32) + bk
            v = jnp.dot(norm, wv, preferred_element_type=jnp.float32) + bv

            # Per-head attention via lane masks (no lane slices / concat / relayouts).
            ctx = jnp.zeros((BS, E), jnp.float32)
            for hh in range(H):
                m = hmask[hh:hh + 1, :]                         # (1, E)
                s = jax.lax.dot_general(                        # (BS, BS) "NT" matmul
                    q * m, k, (((1,), (1,)), ((), ())),
                    preferred_element_type=jnp.float32)
                s = s + bias                                    # mask cross-sample keys
                s = s - jnp.max(s, axis=-1, keepdims=True)
                p = jnp.exp(s)
                p = p * pl.reciprocal(jnp.sum(p, axis=-1, keepdims=True), approx=True)
                # p @ (v * m) has exact zeros outside head hh's columns ->
                # summing over heads == concatenated multi-head context.
                ctx = ctx + jnp.dot(p, v * m, preferred_element_type=jnp.float32)

            attn_out = jnp.dot(ctx, wo, preferred_element_type=jnp.float32) + bo
            h = h + attn_out                                     # residual on raw input

        # Write back only the CLS rows (token 0 of every sample).
        o_ref[0] = h[:B, :]

    return kernel


# ------------------------------ JAX wrapper ----------------------------------

def hsvit_het_forward(pixel_values, params, *, conv_kernel_num, attn_num,
                      attn_depth, num_heads):
    """Replicates HSViTHETModel.forward with enable_conv_layer=False."""
    B, C, H, W = pixel_values.shape
    E = params['pos'].shape[-1]
    assert H * W == E, 'height x width must equal attn_embed_dim'
    assert conv_kernel_num % attn_num == 0
    assert E % num_heads == 0
    head_dim = E // num_heads

    # --- glue (plain JAX): flatten, tile channels, split into attention groups ---
    x = pixel_values.reshape(B, C, H * W).astype(jnp.float32)
    reps = conv_kernel_num // C + 1
    x = jnp.tile(x, (1, reps, 1))[:, :conv_kernel_num, :]           # (B, K, E)
    G = conv_kernel_num // attn_num
    x = x.reshape(B, attn_num, G, E).transpose(1, 0, 2, 3)           # (A, B, G, E)
    cls = jnp.broadcast_to(params['cls'], (attn_num, B, 1, E))
    x = jnp.concatenate([cls, x], axis=2)                            # (A, B, S, E)
    x = x + params['pos']                                            # (A, B, S, E)
    S = G + 1
    A, D = attn_num, attn_depth
    BS = S * B

    # Token-major flattening: (A, B, S, E) -> (A, S, B, E) -> (A, S*B, E).
    # CLS tokens land on rows [0, B); row t belongs to sample t % B.
    x = jnp.transpose(x, (0, 2, 1, 3)).reshape(A, BS, E)

    # One-time weight preprocessing: split packed QKV, fold 1/sqrt(head_dim) into Q.
    scale = jnp.float32(1.0 / (head_dim ** 0.5))
    w_qkv, b_qkv = params['w_qkv'], params['b_qkv']                  # (A,D,E,3E) / (A,D,1,3E)
    w_q = w_qkv[..., :E] * scale
    w_k = w_qkv[..., E:2 * E]
    w_v = w_qkv[..., 2 * E:]
    b_q = b_qkv[..., :E] * scale
    b_k = b_qkv[..., E:2 * E]
    b_v = b_qkv[..., 2 * E:]

    # Additive cross-sample mask for the flattened slab.
    tok_b = jnp.arange(BS, dtype=jnp.int32) % B
    attn_bias = jnp.where(tok_b[:, None] == tok_b[None, :],
                          jnp.float32(0.0), jnp.float32(-1e30))      # (BS, BS)

    # Per-head lane masks.
    lane = jnp.arange(E, dtype=jnp.int32) // head_dim
    head_mask = (lane[None, :] ==
                 jnp.arange(num_heads, dtype=jnp.int32)[:, None]).astype(jnp.float32)

    kernel = _make_group_kernel(D, num_heads, B, S, E)

    w_idx = lambda a: (a, 0, 0, 0)
    in_specs = [
        pl.BlockSpec((1, BS, E), lambda a: (a, 0, 0)),               # x (per group)
        pl.BlockSpec((BS, BS), lambda a: (0, 0)),                    # cross-sample bias
        pl.BlockSpec((num_heads, E), lambda a: (0, 0)),              # head lane masks
        pl.BlockSpec((1, D, 1, E), w_idx),                           # ln gamma (all depths)
        pl.BlockSpec((1, D, 1, E), w_idx),                           # ln beta
        pl.BlockSpec((1, D, E, E), w_idx),                           # W_q (scale folded)
        pl.BlockSpec((1, D, E, E), w_idx),                           # W_k
        pl.BlockSpec((1, D, E, E), w_idx),                           # W_v
        pl.BlockSpec((1, D, 1, E), w_idx),                           # b_q
        pl.BlockSpec((1, D, 1, E), w_idx),                           # b_k
        pl.BlockSpec((1, D, 1, E), w_idx),                           # b_v
        pl.BlockSpec((1, D, E, E), w_idx),                           # W_out
        pl.BlockSpec((1, D, 1, E), w_idx),                           # b_out
    ]
    out_specs = pl.BlockSpec((1, B, E), lambda a: (a, 0, 0))

    cls_out = pl.pallas_call(
        kernel,
        out_shape=jax.ShapeDtypeStruct((A, B, E), jnp.float32),
        grid_spec=pltpu.PrefetchScalarGridSpec(
            num_scalar_prefetch=0,
            grid=(A,),
            in_specs=in_specs,
            out_specs=out_specs,
        ),
        compiler_params=pltpu.CompilerParams(
            dimension_semantics=("parallel",),                       # groups shard across TCs
            vmem_limit_bytes=64 << 20),
    )(x, attn_bias, head_mask, params['ln_g'], params['ln_b'],
      w_q, w_k, w_v, b_q, b_k, b_v, params['w_out'], params['b_out'])

    return jnp.transpose(cls_out, (1, 0, 2))                         # (B, A, E)


# --------------------------- pure-JAX reference -------------------------------

def hsvit_het_reference(pixel_values, params, *, conv_kernel_num, attn_num,
                        attn_depth, num_heads):
    B, C, H, W = pixel_values.shape
    E = params['pos'].shape[-1]
    x = pixel_values.reshape(B, C, H * W).astype(jnp.float32)
    reps = conv_kernel_num // C + 1
    x = jnp.tile(x, (1, reps, 1))[:, :conv_kernel_num, :]
    G = conv_kernel_num // attn_num
    x = x.reshape(B, attn_num, G, E).transpose(1, 0, 2, 3)
    cls = jnp.broadcast_to(params['cls'], (attn_num, B, 1, E))
    x = jnp.concatenate([cls, x], axis=2) + params['pos']
    head_dim = E // num_heads

    outs = []
    for a in range(attn_num):
        h = x[a]                                                     # (B, S, E)
        for d in range(attn_depth):
            g = params['ln_g'][a, d, 0]
            b_ = params['ln_b'][a, d, 0]
            mean = h.mean(-1, keepdims=True)
            var = ((h - mean) ** 2).mean(-1, keepdims=True)
            norm = (h - mean) / jnp.sqrt(var + 1e-5) * g + b_
            qkv = norm @ params['w_qkv'][a, d] + params['b_qkv'][a, d, 0]
            q, k, v = qkv[..., :E], qkv[..., E:2 * E], qkv[..., 2 * E:]
            Bq, S, _ = q.shape
            q = q.reshape(Bq, S, num_heads, head_dim) * (head_dim ** -0.5)
            k = k.reshape(Bq, S, num_heads, head_dim)
            v = v.reshape(Bq, S, num_heads, head_dim)
            s = jnp.einsum('bqhd,bkhd->bhqk', q, k)
            p = jax.nn.softmax(s, axis=-1)
            ctx = jnp.einsum('bhqk,bkhd->bqhd', p, v).reshape(Bq, S, E)
            h = h + ctx @ params['w_out'][a, d] + params['b_out'][a, d, 0]
        outs.append(h[:, 0, :])
    return jnp.stack(outs, axis=1)                                   # (B, A, E)


# ---------------------------------- main --------------------------------------

if __name__ == "__main__":
    # Small config consistent with the module (H*W must equal attn_embed_dim).
    B, C, H, W = 2, 4, 8, 8
    attn_embed_dim = H * W          # 64
    conv_kernel_num = 8
    attn_num = 2
    attn_depth = 2
    num_heads = 4

    A, D, E = attn_num, attn_depth, attn_embed_dim
    S = conv_kernel_num // attn_num + 1

    key = jax.random.PRNGKey(0)
    keys = jax.random.split(key, 7)

    # Deterministic synthetic parameters (shapes from the module __init__).
    params = {
        'cls': jax.random.normal(keys[0], (A, 1, 1, E), jnp.float32),
        'pos': jax.random.normal(keys[1], (A, 1, S, E), jnp.float32),
        'ln_g': jnp.ones((A, D, 1, E), jnp.float32),
        'ln_b': jnp.zeros((A, D, 1, E), jnp.float32),
        # stored pre-transposed relative to torch (in_proj_weight.T, out_proj.weight.T)
        'w_qkv': jax.random.normal(keys[2], (A, D, E, 3 * E), jnp.float32) * 0.05,
        'b_qkv': jax.random.normal(keys[3], (A, D, 1, 3 * E), jnp.float32) * 0.02,
        'w_out': jax.random.normal(keys[4], (A, D, E, E), jnp.float32) * 0.05,
        'b_out': jax.random.normal(keys[5], (A, D, 1, E), jnp.float32) * 0.02,
    }

    pixel_values = jax.random.normal(keys[6], (B, C, H, W), jnp.float32)

    fwd = functools.partial(hsvit_het_forward,
                            conv_kernel_num=conv_kernel_num, attn_num=attn_num,
                            attn_depth=attn_depth, num_heads=num_heads)

    out = jax.block_until_ready(fwd(pixel_values, params))
    assert out.shape == (B, attn_num, attn_embed_dim), out.shape

    ref = jax.block_until_ready(
        hsvit_het_reference(pixel_values, params,
                            conv_kernel_num=conv_kernel_num, attn_num=attn_num,
                            attn_depth=attn_depth, num_heads=num_heads))
    assert np.allclose(np.asarray(out), np.asarray(ref), rtol=2e-3, atol=2e-3), \
        float(np.max(np.abs(np.asarray(out) - np.asarray(ref))))

    print("KERNEL_OK")
</pallas_src>

<mosaic_0001>
module attributes {stable_mosaic.version = 11 : i64} {
  func.func @kernel(%arg0: i32, %arg1: memref<1x10x64xf32, #tpu.memory_space<vmem>>, %arg2: memref<10x10xf32, #tpu.memory_space<vmem>>, %arg3: memref<4x64xf32, #tpu.memory_space<vmem>>, %arg4: memref<1x2x1x64xf32, #tpu.memory_space<vmem>>, %arg5: memref<1x2x1x64xf32, #tpu.memory_space<vmem>>, %arg6: memref<1x2x64x64xf32, #tpu.memory_space<vmem>>, %arg7: memref<1x2x64x64xf32, #tpu.memory_space<vmem>>, %arg8: memref<1x2x64x64xf32, #tpu.memory_space<vmem>>, %arg9: memref<1x2x1x64xf32, #tpu.memory_space<vmem>>, %arg10: memref<1x2x1x64xf32, #tpu.memory_space<vmem>>, %arg11: memref<1x2x1x64xf32, #tpu.memory_space<vmem>>, %arg12: memref<1x2x64x64xf32, #tpu.memory_space<vmem>>, %arg13: memref<1x2x1x64xf32, #tpu.memory_space<vmem>>, %arg14: memref<1x2x64xf32, #tpu.memory_space<vmem>>) attributes {dimension_semantics = [#tpu.dimension_semantics<parallel>], iteration_bounds = array<i64: 2>, scalar_prefetch = 0 : i64, scratch_operands = 0 : i64, tpu.core_type = #tpu.core_type<tc>, window_params = [{transform_indices = @transform_0, window_bounds = array<i64: 1, 10, 64>}, {pipeline_mode = #tpu.pipeline_mode<synchronous>, transform_indices = @transform_1, window_bounds = array<i64: 10, 10>}, {pipeline_mode = #tpu.pipeline_mode<synchronous>, transform_indices = @transform_2, window_bounds = array<i64: 4, 64>}, {transform_indices = @transform_3, window_bounds = array<i64: 1, 2, 1, 64>}, {transform_indices = @transform_4, window_bounds = array<i64: 1, 2, 1, 64>}, {transform_indices = @transform_5, window_bounds = array<i64: 1, 2, 64, 64>}, {transform_indices = @transform_6, window_bounds = array<i64: 1, 2, 64, 64>}, {transform_indices = @transform_7, window_bounds = array<i64: 1, 2, 64, 64>}, {transform_indices = @transform_8, window_bounds = array<i64: 1, 2, 1, 64>}, {transform_indices = @transform_9, window_bounds = array<i64: 1, 2, 1, 64>}, {transform_indices = @transform_10, window_bounds = array<i64: 1, 2, 1, 64>}, {transform_indices = @transform_11, window_bounds = array<i64: 1, 2, 64, 64>}, {transform_indices = @transform_12, window_bounds = array<i64: 1, 2, 1, 64>}, {transform_indices = @transform_13, window_bounds = array<i64: 1, 2, 64>}]} {
    %c0 = arith.constant 0 : index
    %c0_0 = arith.constant 0 : index
    %c0_1 = arith.constant 0 : index
    %0 = vector.load %arg1[%c0, %c0_0, %c0_1] : memref<1x10x64xf32, #tpu.memory_space<vmem>>, vector<1x10x64xf32>
    %1 = vector.shape_cast %0 : vector<1x10x64xf32> to vector<10x64xf32>
    %c0_2 = arith.constant 0 : index
    %c0_3 = arith.constant 0 : index
    %2 = vector.load %arg2[%c0_2, %c0_3] : memref<10x10xf32, #tpu.memory_space<vmem>>, vector<10x10xf32>
    %c0_4 = arith.constant 0 : index
    %c0_5 = arith.constant 0 : index
    %3 = vector.load %arg3[%c0_4, %c0_5] : memref<4x64xf32, #tpu.memory_space<vmem>>, vector<4x64xf32>
    %c0_6 = arith.constant 0 : index
    %c0_7 = arith.constant 0 : index
    %c0_8 = arith.constant 0 : index
    %c0_9 = arith.constant 0 : index
    %4 = vector.load %arg4[%c0_6, %c0_7, %c0_8, %c0_9] : memref<1x2x1x64xf32, #tpu.memory_space<vmem>>, vector<1x1x1x64xf32>
    %5 = vector.shape_cast %4 : vector<1x1x1x64xf32> to vector<1x64xf32>
    %c0_10 = arith.constant 0 : index
    %c0_11 = arith.constant 0 : index
    %c0_12 = arith.constant 0 : index
    %c0_13 = arith.constant 0 : index
    %6 = vector.load %arg5[%c0_10, %c0_11, %c0_12, %c0_13] : memref<1x2x1x64xf32, #tpu.memory_space<vmem>>, vector<1x1x1x64xf32>
    %7 = vector.shape_cast %6 : vector<1x1x1x64xf32> to vector<1x64xf32>
    %c0_14 = arith.constant 0 : index
    %c0_15 = arith.constant 0 : index
    %c0_16 = arith.constant 0 : index
    %c0_17 = arith.constant 0 : index
    %8 = vector.load %arg6[%c0_14, %c0_15, %c0_16, %c0_17] : memref<1x2x64x64xf32, #tpu.memory_space<vmem>>, vector<1x1x64x64xf32>
    %9 = vector.shape_cast %8 : vector<1x1x64x64xf32> to vector<64x64xf32>
    %c0_18 = arith.constant 0 : index
    %c0_19 = arith.constant 0 : index
    %c0_20 = arith.constant 0 : index
    %c0_21 = arith.constant 0 : index
    %10 = vector.load %arg7[%c0_18, %c0_19, %c0_20, %c0_21] : memref<1x2x64x64xf32, #tpu.memory_space<vmem>>, vector<1x1x64x64xf32>
    %11 = vector.shape_cast %10 : vector<1x1x64x64xf32> to vector<64x64xf32>
    %c0_22 = arith.constant 0 : index
    %c0_23 = arith.constant 0 : index
    %c0_24 = arith.constant 0 : index
    %c0_25 = arith.constant 0 : index
    %12 = vector.load %arg8[%c0_22, %c0_23, %c0_24, %c0_25] : memref<1x2x64x64xf32, #tpu.memory_space<vmem>>, vector<1x1x64x64xf32>
    %13 = vector.shape_cast %12 : vector<1x1x64x64xf32> to vector<64x64xf32>
    %c0_26 = arith.constant 0 : index
    %c0_27 = arith.constant 0 : index
    %c0_28 = arith.constant 0 : index
    %c0_29 = arith.constant 0 : index
    %14 = vector.load %arg9[%c0_26, %c0_27, %c0_28, %c0_29] : memref<1x2x1x64xf32, #tpu.memory_space<vmem>>, vector<1x1x1x64xf32>
    %15 = vector.shape_cast %14 : vector<1x1x1x64xf32> to vector<1x64xf32>
    %c0_30 = arith.constant 0 : index
    %c0_31 = arith.constant 0 : index
    %c0_32 = arith.constant 0 : index
    %c0_33 = arith.constant 0 : index
    %16 = vector.load %arg10[%c0_30, %c0_31, %c0_32, %c0_33] : memref<1x2x1x64xf32, #tpu.memory_space<vmem>>, vector<1x1x1x64xf32>
    %17 = vector.shape_cast %16 : vector<1x1x1x64xf32> to vector<1x64xf32>
    %c0_34 = arith.constant 0 : index
    %c0_35 = arith.constant 0 : index
    %c0_36 = arith.constant 0 : index
    %c0_37 = arith.constant 0 : index
    %18 = vector.load %arg11[%c0_34, %c0_35, %c0_36, %c0_37] : memref<1x2x1x64xf32, #tpu.memory_space<vmem>>, vector<1x1x1x64xf32>
    %19 = vector.shape_cast %18 : vector<1x1x1x64xf32> to vector<1x64xf32>
    %c0_38 = arith.constant 0 : index
    %c0_39 = arith.constant 0 : index
    %c0_40 = arith.constant 0 : index
    %c0_41 = arith.constant 0 : index
    %20 = vector.load %arg12[%c0_38, %c0_39, %c0_40, %c0_41] : memref<1x2x64x64xf32, #tpu.memory_space<vmem>>, vector<1x1x64x64xf32>
    %21 = vector.shape_cast %20 : vector<1x1x64x64xf32> to vector<64x64xf32>
    %c0_42 = arith.constant 0 : index
    %c0_43 = arith.constant 0 : index
    %c0_44 = arith.constant 0 : index
    %c0_45 = arith.constant 0 : index
    %22 = vector.load %arg13[%c0_42, %c0_43, %c0_44, %c0_45] : memref<1x2x1x64xf32, #tpu.memory_space<vmem>>, vector<1x1x1x64xf32>
    %23 = vector.shape_cast %22 : vector<1x1x1x64xf32> to vector<1x64xf32>
    %cst = arith.constant dense<0.000000e+00> : vector<10xf32>
    %24 = vector.multi_reduction <add>, %1, %cst [1] : vector<10x64xf32> to vector<10xf32>
    %25 = vector.shape_cast %24 : vector<10xf32> to vector<10x1xf32>
    %cst_46 = arith.constant 6.400000e+01 : f32
    %26 = vector.broadcast %cst_46 : f32 to vector<10x1xf32>
    %27 = arith.divf %25, %26 : vector<10x1xf32>
    %28 = vector.broadcast %27 : vector<10x1xf32> to vector<10x64xf32>
    %29 = arith.subf %1, %28 : vector<10x64xf32>
    %30 = arith.mulf %29, %29 : vector<10x64xf32>
    %cst_47 = arith.constant dense<0.000000e+00> : vector<10xf32>
    %31 = vector.multi_reduction <add>, %30, %cst_47 [1] : vector<10x64xf32> to vector<10xf32>
    %32 = vector.shape_cast %31 : vector<10xf32> to vector<10x1xf32>
    %cst_48 = arith.constant 6.400000e+01 : f32
    %33 = vector.broadcast %cst_48 : f32 to vector<10x1xf32>
    %34 = arith.divf %32, %33 : vector<10x1xf32>
    %cst_49 = arith.constant 9.99999974E-6 : f32
    %35 = vector.broadcast %cst_49 : f32 to vector<10x1xf32>
    %36 = arith.addf %34, %35 : vector<10x1xf32>
    %37 = math.rsqrt %36 : vector<10x1xf32>
    %38 = vector.broadcast %37 : vector<10x1xf32> to vector<10x64xf32>
    %39 = arith.mulf %29, %38 : vector<10x64xf32>
    %40 = vector.broadcast %5 : vector<1x64xf32> to vector<10x64xf32>
    %41 = arith.mulf %39, %40 : vector<10x64xf32>
    %42 = vector.broadcast %7 : vector<1x64xf32> to vector<10x64xf32>
    %43 = arith.addf %41, %42 : vector<10x64xf32>
    %cst_50 = arith.constant dense<0.000000e+00> : vector<10x64xf32>
    %44 = tpu.matmul %43, %9, %cst_50 {dimension_numbers = #tpu.dot_dimension_numbers<[1], [0], [0], [1], [0, 0, 1, 1], [], []>} : vector<10x64xf32>, vector<64x64xf32>, vector<10x64xf32> -> vector<10x64xf32>
    %45 = vector.broadcast %15 : vector<1x64xf32> to vector<10x64xf32>
    %46 = arith.addf %44, %45 : vector<10x64xf32>
    %cst_51 = arith.constant dense<0.000000e+00> : vector<10x64xf32>
    %47 = tpu.matmul %43, %11, %cst_51 {dimension_numbers = #tpu.dot_dimension_numbers<[1], [0], [0], [1], [0, 0, 1, 1], [], []>} : vector<10x64xf32>, vector<64x64xf32>, vector<10x64xf32> -> vector<10x64xf32>
    %48 = vector.broadcast %17 : vector<1x64xf32> to vector<10x64xf32>
    %49 = arith.addf %47, %48 : vector<10x64xf32>
    %cst_52 = arith.constant dense<0.000000e+00> : vector<10x64xf32>
    %50 = tpu.matmul %43, %13, %cst_52 {dimension_numbers = #tpu.dot_dimension_numbers<[1], [0], [0], [1], [0, 0, 1, 1], [], []>} : vector<10x64xf32>, vector<64x64xf32>, vector<10x64xf32> -> vector<10x64xf32>
    %51 = vector.broadcast %19 : vector<1x64xf32> to vector<10x64xf32>
    %52 = arith.addf %50, %51 : vector<10x64xf32>
    %cst_53 = arith.constant 0.000000e+00 : f32
    %53 = vector.broadcast %cst_53 : f32 to vector<10x64xf32>
    %54 = vector.extract_strided_slice %3 {offsets = [0, 0], sizes = [1, 64], strides = [1, 1]} : vector<4x64xf32> to vector<1x64xf32>
    %55 = vector.broadcast %54 : vector<1x64xf32> to vector<10x64xf32>
    %56 = arith.mulf %46, %55 : vector<10x64xf32>
    %cst_54 = arith.constant dense<0.000000e+00> : vector<10x10xf32>
    %57 = tpu.matmul %56, %49, %cst_54 {dimension_numbers = #tpu.dot_dimension_numbers<[1], [1], [0], [0], [0, 0, 1, 0], [], []>} : vector<10x64xf32>, vector<10x64xf32>, vector<10x10xf32> -> vector<10x10xf32>
    %58 = arith.addf %57, %2 : vector<10x10xf32>
    %cst_55 = arith.constant dense<0xFF800000> : vector<10xf32>
    %59 = vector.multi_reduction <maximumf>, %58, %cst_55 [1] : vector<10x10xf32> to vector<10xf32>
    %60 = vector.shape_cast %59 : vector<10xf32> to vector<10x1xf32>
    %61 = vector.broadcast %60 : vector<10x1xf32> to vector<10x10xf32>
    %62 = arith.subf %58, %61 : vector<10x10xf32>
    %63 = math.exp %62 : vector<10x10xf32>
    %cst_56 = arith.constant dense<0.000000e+00> : vector<10xf32>
    %64 = vector.multi_reduction <add>, %63, %cst_56 [1] : vector<10x10xf32> to vector<10xf32>
    %65 = vector.shape_cast %64 : vector<10xf32> to vector<10x1xf32>
    %66 = tpu.reciprocal %65 {approx = true} : vector<10x1xf32> -> vector<10x1xf32>
    %67 = vector.broadcast %66 : vector<10x1xf32> to vector<10x10xf32>
    %68 = arith.mulf %63, %67 : vector<10x10xf32>
    %69 = vector.broadcast %54 : vector<1x64xf32> to vector<10x64xf32>
    %70 = arith.mulf %52, %69 : vector<10x64xf32>
    %cst_57 = arith.constant dense<0.000000e+00> : vector<10x64xf32>
    %71 = tpu.matmul %68, %70, %cst_57 {dimension_numbers = #tpu.dot_dimension_numbers<[1], [0], [0], [1], [0, 0, 1, 1], [], []>} : vector<10x10xf32>, vector<10x64xf32>, vector<10x64xf32> -> vector<10x64xf32>
    %72 = arith.addf %53, %71 : vector<10x64xf32>
    %73 = vector.extract_strided_slice %3 {offsets = [1, 0], sizes = [1, 64], strides = [1, 1]} : vector<4x64xf32> to vector<1x64xf32>
    %74 = vector.broadcast %73 : vector<1x64xf32> to vector<10x64xf32>
    %75 = arith.mulf %46, %74 : vector<10x64xf32>
    %cst_58 = arith.constant dense<0.000000e+00> : vector<10x10xf32>
    %76 = tpu.matmul %75, %49, %cst_58 {dimension_numbers = #tpu.dot_dimension_numbers<[1], [1], [0], [0], [0, 0, 1, 0], [], []>} : vector<10x64xf32>, vector<10x64xf32>, vector<10x10xf32> -> vector<10x10xf32>
    %77 = arith.addf %76, %2 : vector<10x10xf32>
    %cst_59 = arith.constant dense<0xFF800000> : vector<10xf32>
    %78 = vector.multi_reduction <maximumf>, %77, %cst_59 [1] : vector<10x10xf32> to vector<10xf32>
    %79 = vector.shape_cast %78 : vector<10xf32> to vector<10x1xf32>
    %80 = vector.broadcast %79 : vector<10x1xf32> to vector<10x10xf32>
    %81 = arith.subf %77, %80 : vector<10x10xf32>
    %82 = math.exp %81 : vector<10x10xf32>
    %cst_60 = arith.constant dense<0.000000e+00> : vector<10xf32>
    %83 = vector.multi_reduction <add>, %82, %cst_60 [1] : vector<10x10xf32> to vector<10xf32>
    %84 = vector.shape_cast %83 : vector<10xf32> to vector<10x1xf32>
    %85 = tpu.reciprocal %84 {approx = true} : vector<10x1xf32> -> vector<10x1xf32>
    %86 = vector.broadcast %85 : vector<10x1xf32> to vector<10x10xf32>
    %87 = arith.mulf %82, %86 : vector<10x10xf32>
    %88 = vector.broadcast %73 : vector<1x64xf32> to vector<10x64xf32>
    %89 = arith.mulf %52, %88 : vector<10x64xf32>
    %cst_61 = arith.constant dense<0.000000e+00> : vector<10x64xf32>
    %90 = tpu.matmul %87, %89, %cst_61 {dimension_numbers = #tpu.dot_dimension_numbers<[1], [0], [0], [1], [0, 0, 1, 1], [], []>} : vector<10x10xf32>, vector<10x64xf32>, vector<10x64xf32> -> vector<10x64xf32>
    %91 = arith.addf %72, %90 : vector<10x64xf32>
    %92 = vector.extract_strided_slice %3 {offsets = [2, 0], sizes = [1, 64], strides = [1, 1]} : vector<4x64xf32> to vector<1x64xf32>
    %93 = vector.broadcast %92 : vector<1x64xf32> to vector<10x64xf32>
    %94 = arith.mulf %46, %93 : vector<10x64xf32>
    %cst_62 = arith.constant dense<0.000000e+00> : vector<10x10xf32>
    %95 = tpu.matmul %94, %49, %cst_62 {dimension_numbers = #tpu.dot_dimension_numbers<[1], [1], [0], [0], [0, 0, 1, 0], [], []>} : vector<10x64xf32>, vector<10x64xf32>, vector<10x10xf32> -> vector<10x10xf32>
    %96 = arith.addf %95, %2 : vector<10x10xf32>
    %cst_63 = arith.constant dense<0xFF800000> : vector<10xf32>
    %97 = vector.multi_reduction <maximumf>, %96, %cst_63 [1] : vector<10x10xf32> to vector<10xf32>
    %98 = vector.shape_cast %97 : vector<10xf32> to vector<10x1xf32>
    %99 = vector.broadcast %98 : vector<10x1xf32> to vector<10x10xf32>
    %100 = arith.subf %96, %99 : vector<10x10xf32>
    %101 = math.exp %100 : vector<10x10xf32>
    %cst_64 = arith.constant dense<0.000000e+00> : vector<10xf32>
    %102 = vector.multi_reduction <add>, %101, %cst_64 [1] : vector<10x10xf32> to vector<10xf32>
    %103 = vector.shape_cast %102 : vector<10xf32> to vector<10x1xf32>
    %104 = tpu.reciprocal %103 {approx = true} : vector<10x1xf32> -> vector<10x1xf32>
    %105 = vector.broadcast %104 : vector<10x1xf32> to vector<10x10xf32>
    %106 = arith.mulf %101, %105 : vector<10x10xf32>
    %107 = vector.broadcast %92 : vector<1x64xf32> to vector<10x64xf32>
    %108 = arith.mulf %52, %107 : vector<10x64xf32>
    %cst_65 = arith.constant dense<0.000000e+00> : vector<10x64xf32>
    %109 = tpu.matmul %106, %108, %cst_65 {dimension_numbers = #tpu.dot_dimension_numbers<[1], [0], [0], [1], [0, 0, 1, 1], [], []>} : vector<10x10xf32>, vector<10x64xf32>, vector<10x64xf32> -> vector<10x64xf32>
    %110 = arith.addf %91, %109 : vector<10x64xf32>
    %111 = vector.extract_strided_slice %3 {offsets = [3, 0], sizes = [1, 64], strides = [1, 1]} : vector<4x64xf32> to vector<1x64xf32>
    %112 = vector.broadcast %111 : vector<1x64xf32> to vector<10x64xf32>
    %113 = arith.mulf %46, %112 : vector<10x64xf32>
    %cst_66 = arith.constant dense<0.000000e+00> : vector<10x10xf32>
    %114 = tpu.matmul %113, %49, %cst_66 {dimension_numbers = #tpu.dot_dimension_numbers<[1], [1], [0], [0], [0, 0, 1, 0], [], []>} : vector<10x64xf32>, vector<10x64xf32>, vector<10x10xf32> -> vector<10x10xf32>
    %115 = arith.addf %114, %2 : vector<10x10xf32>
    %cst_67 = arith.constant dense<0xFF800000> : vector<10xf32>
    %116 = vector.multi_reduction <maximumf>, %115, %cst_67 [1] : vector<10x10xf32> to vector<10xf32>
    %117 = vector.shape_cast %116 : vector<10xf32> to vector<10x1xf32>
    %118 = vector.broadcast %117 : vector<10x1xf32> to vector<10x10xf32>
    %119 = arith.subf %115, %118 : vector<10x10xf32>
    %120 = math.exp %119 : vector<10x10xf32>
    %cst_68 = arith.constant dense<0.000000e+00> : vector<10xf32>
    %121 = vector.multi_reduction <add>, %120, %cst_68 [1] : vector<10x10xf32> to vector<10xf32>
    %122 = vector.shape_cast %121 : vector<10xf32> to vector<10x1xf32>
    %123 = tpu.reciprocal %122 {approx = true} : vector<10x1xf32> -> vector<10x1xf32>
    %124 = vector.broadcast %123 : vector<10x1xf32> to vector<10x10xf32>
    %125 = arith.mulf %120, %124 : vector<10x10xf32>
    %126 = vector.broadcast %111 : vector<1x64xf32> to vector<10x64xf32>
    %127 = arith.mulf %52, %126 : vector<10x64xf32>
    %cst_69 = arith.constant dense<0.000000e+00> : vector<10x64xf32>
    %128 = tpu.matmul %125, %127, %cst_69 {dimension_numbers = #tpu.dot_dimension_numbers<[1], [0], [0], [1], [0, 0, 1, 1], [], []>} : vector<10x10xf32>, vector<10x64xf32>, vector<10x64xf32> -> vector<10x64xf32>
    %129 = arith.addf %110, %128 : vector<10x64xf32>
    %cst_70 = arith.constant dense<0.000000e+00> : vector<10x64xf32>
    %130 = tpu.matmul %129, %21, %cst_70 {dimension_numbers = #tpu.dot_dimension_numbers<[1], [0], [0], [1], [0, 0, 1, 1], [], []>} : vector<10x64xf32>, vector<64x64xf32>, vector<10x64xf32> -> vector<10x64xf32>
    %131 = vector.broadcast %23 : vector<1x64xf32> to vector<10x64xf32>
    %132 = arith.addf %130, %131 : vector<10x64xf32>
    %133 = arith.addf %1, %132 : vector<10x64xf32>
    %c0_71 = arith.constant 0 : index
    %c1 = arith.constant 1 : index
    %c0_72 = arith.constant 0 : index
    %c0_73 = arith.constant 0 : index
    %134 = vector.load %arg4[%c0_71, %c1, %c0_72, %c0_73] : memref<1x2x1x64xf32, #tpu.memory_space<vmem>>, vector<1x1x1x64xf32>
    %135 = vector.shape_cast %134 : vector<1x1x1x64xf32> to vector<1x64xf32>
    %c0_74 = arith.constant 0 : index
    %c1_75 = arith.constant 1 : index
    %c0_76 = arith.constant 0 : index
    %c0_77 = arith.constant 0 : index
    %136 = vector.load %arg5[%c0_74, %c1_75, %c0_76, %c0_77] : memref<1x2x1x64xf32, #tpu.memory_space<vmem>>, vector<1x1x1x64xf32>
    %137 = vector.shape_cast %136 : vector<1x1x1x64xf32> to vector<1x64xf32>
    %c0_78 = arith.constant 0 : index
    %c1_79 = arith.constant 1 : index
    %c0_80 = arith.constant 0 : index
    %c0_81 = arith.constant 0 : index
    %138 = vector.load %arg6[%c0_78, %c1_79, %c0_80, %c0_81] : memref<1x2x64x64xf32, #tpu.memory_space<vmem>>, vector<1x1x64x64xf32>
    %139 = vector.shape_cast %138 : vector<1x1x64x64xf32> to vector<64x64xf32>
    %c0_82 = arith.constant 0 : index
    %c1_83 = arith.constant 1 : index
    %c0_84 = arith.constant 0 : index
    %c0_85 = arith.constant 0 : index
    %140 = vector.load %arg7[%c0_82, %c1_83, %c0_84, %c0_85] : memref<1x2x64x64xf32, #tpu.memory_space<vmem>>, vector<1x1x64x64xf32>
    %141 = vector.shape_cast %140 : vector<1x1x64x64xf32> to vector<64x64xf32>
    %c0_86 = arith.constant 0 : index
    %c1_87 = arith.constant 1 : index
    %c0_88 = arith.constant 0 : index
    %c0_89 = arith.constant 0 : index
    %142 = vector.load %arg8[%c0_86, %c1_87, %c0_88, %c0_89] : memref<1x2x64x64xf32, #tpu.memory_space<vmem>>, vector<1x1x64x64xf32>
    %143 = vector.shape_cast %142 : vector<1x1x64x64xf32> to vector<64x64xf32>
    %c0_90 = arith.constant 0 : index
    %c1_91 = arith.constant 1 : index
    %c0_92 = arith.constant 0 : index
    %c0_93 = arith.constant 0 : index
    %144 = vector.load %arg9[%c0_90, %c1_91, %c0_92, %c0_93] : memref<1x2x1x64xf32, #tpu.memory_space<vmem>>, vector<1x1x1x64xf32>
    %145 = vector.shape_cast %144 : vector<1x1x1x64xf32> to vector<1x64xf32>
    %c0_94 = arith.constant 0 : index
    %c1_95 = arith.constant 1 : index
    %c0_96 = arith.constant 0 : index
    %c0_97 = arith.constant 0 : index
    %146 = vector.load %arg10[%c0_94, %c1_95, %c0_96, %c0_97] : memref<1x2x1x64xf32, #tpu.memory_space<vmem>>, vector<1x1x1x64xf32>
    %147 = vector.shape_cast %146 : vector<1x1x1x64xf32> to vector<1x64xf32>
    %c0_98 = arith.constant 0 : index
    %c1_99 = arith.constant 1 : index
    %c0_100 = arith.constant 0 : index
    %c0_101 = arith.constant 0 : index
    %148 = vector.load %arg11[%c0_98, %c1_99, %c0_100, %c0_101] : memref<1x2x1x64xf32, #tpu.memory_space<vmem>>, vector<1x1x1x64xf32>
    %149 = vector.shape_cast %148 : vector<1x1x1x64xf32> to vector<1x64xf32>
    %c0_102 = arith.constant 0 : index
    %c1_103 = arith.constant 1 : index
    %c0_104 = arith.constant 0 : index
    %c0_105 = arith.constant 0 : index
    %150 = vector.load %arg12[%c0_102, %c1_103, %c0_104, %c0_105] : memref<1x2x64x64xf32, #tpu.memory_space<vmem>>, vector<1x1x64x64xf32>
    %151 = vector.shape_cast %150 : vector<1x1x64x64xf32> to vector<64x64xf32>
    %c0_106 = arith.constant 0 : index
    %c1_107 = arith.constant 1 : index
    %c0_108 = arith.constant 0 : index
    %c0_109 = arith.constant 0 : index
    %152 = vector.load %arg13[%c0_106, %c1_107, %c0_108, %c0_109] : memref<1x2x1x64xf32, #tpu.memory_space<vmem>>, vector<1x1x1x64xf32>
    %153 = vector.shape_cast %152 : vector<1x1x1x64xf32> to vector<1x64xf32>
    %cst_110 = arith.constant dense<0.000000e+00> : vector<10xf32>
    %154 = vector.multi_reduction <add>, %133, %cst_110 [1] : vector<10x64xf32> to vector<10xf32>
    %155 = vector.shape_cast %154 : vector<10xf32> to vector<10x1xf32>
    %cst_111 = arith.constant 6.400000e+01 : f32
    %156 = vector.broadcast %cst_111 : f32 to vector<10x1xf32>
    %157 = arith.divf %155, %156 : vector<10x1xf32>
    %158 = vector.broadcast %157 : vector<10x1xf32> to vector<10x64xf32>
    %159 = arith.subf %133, %158 : vector<10x64xf32>
    %160 = arith.mulf %159, %159 : vector<10x64xf32>
    %cst_112 = arith.constant dense<0.000000e+00> : vector<10xf32>
    %161 = vector.multi_reduction <add>, %160, %cst_112 [1] : vector<10x64xf32> to vector<10xf32>
    %162 = vector.shape_cast %161 : vector<10xf32> to vector<10x1xf32>
    %cst_113 = arith.constant 6.400000e+01 : f32
    %163 = vector.broadcast %cst_113 : f32 to vector<10x1xf32>
    %164 = arith.divf %162, %163 : vector<10x1xf32>
    %cst_114 = arith.constant 9.99999974E-6 : f32
    %165 = vector.broadcast %cst_114 : f32 to vector<10x1xf32>
    %166 = arith.addf %164, %165 : vector<10x1xf32>
    %167 = math.rsqrt %166 : vector<10x1xf32>
    %168 = vector.broadcast %167 : vector<10x1xf32> to vector<10x64xf32>
    %169 = arith.mulf %159, %168 : vector<10x64xf32>
    %170 = vector.broadcast %135 : vector<1x64xf32> to vector<10x64xf32>
    %171 = arith.mulf %169, %170 : vector<10x64xf32>
    %172 = vector.broadcast %137 : vector<1x64xf32> to vector<10x64xf32>
    %173 = arith.addf %171, %172 : vector<10x64xf32>
    %cst_115 = arith.constant dense<0.000000e+00> : vector<10x64xf32>
    %174 = tpu.matmul %173, %139, %cst_115 {dimension_numbers = #tpu.dot_dimension_numbers<[1], [0], [0], [1], [0, 0, 1, 1], [], []>} : vector<10x64xf32>, vector<64x64xf32>, vector<10x64xf32> -> vector<10x64xf32>
    %175 = vector.broadcast %145 : vector<1x64xf32> to vector<10x64xf32>
    %176 = arith.addf %174, %175 : vector<10x64xf32>
    %cst_116 = arith.constant dense<0.000000e+00> : vector<10x64xf32>
    %177 = tpu.matmul %173, %141, %cst_116 {dimension_numbers = #tpu.dot_dimension_numbers<[1], [0], [0], [1], [0, 0, 1, 1], [], []>} : vector<10x64xf32>, vector<64x64xf32>, vector<10x64xf32> -> vector<10x64xf32>
    %178 = vector.broadcast %147 : vector<1x64xf32> to vector<10x64xf32>
    %179 = arith.addf %177, %178 : vector<10x64xf32>
    %cst_117 = arith.constant dense<0.000000e+00> : vector<10x64xf32>
    %180 = tpu.matmul %173, %143, %cst_117 {dimension_numbers = #tpu.dot_dimension_numbers<[1], [0], [0], [1], [0, 0, 1, 1], [], []>} : vector<10x64xf32>, vector<64x64xf32>, vector<10x64xf32> -> vector<10x64xf32>
    %181 = vector.broadcast %149 : vector<1x64xf32> to vector<10x64xf32>
    %182 = arith.addf %180, %181 : vector<10x64xf32>
    %cst_118 = arith.constant 0.000000e+00 : f32
    %183 = vector.broadcast %cst_118 : f32 to vector<10x64xf32>
    %184 = vector.extract_strided_slice %3 {offsets = [0, 0], sizes = [1, 64], strides = [1, 1]} : vector<4x64xf32> to vector<1x64xf32>
    %185 = vector.broadcast %184 : vector<1x64xf32> to vector<10x64xf32>
    %186 = arith.mulf %176, %185 : vector<10x64xf32>
    %cst_119 = arith.constant dense<0.000000e+00> : vector<10x10xf32>
    %187 = tpu.matmul %186, %179, %cst_119 {dimension_numbers = #tpu.dot_dimension_numbers<[1], [1], [0], [0], [0, 0, 1, 0], [], []>} : vector<10x64xf32>, vector<10x64xf32>, vector<10x10xf32> -> vector<10x10xf32>
    %188 = arith.addf %187, %2 : vector<10x10xf32>
    %cst_120 = arith.constant dense<0xFF800000> : vector<10xf32>
    %189 = vector.multi_reduction <maximumf>, %188, %cst_120 [1] : vector<10x10xf32> to vector<10xf32>
    %190 = vector.shape_cast %189 : vector<10xf32> to vector<10x1xf32>
    %191 = vector.broadcast %190 : vector<10x1xf32> to vector<10x10xf32>
    %192 = arith.subf %188, %191 : vector<10x10xf32>
    %193 = math.exp %192 : vector<10x10xf32>
    %cst_121 = arith.constant dense<0.000000e+00> : vector<10xf32>
    %194 = vector.multi_reduction <add>, %193, %cst_121 [1] : vector<10x10xf32> to vector<10xf32>
    %195 = vector.shape_cast %194 : vector<10xf32> to vector<10x1xf32>
    %196 = tpu.reciprocal %195 {approx = true} : vector<10x1xf32> -> vector<10x1xf32>
    %197 = vector.broadcast %196 : vector<10x1xf32> to vector<10x10xf32>
    %198 = arith.mulf %193, %197 : vector<10x10xf32>
    %199 = vector.broadcast %184 : vector<1x64xf32> to vector<10x64xf32>
    %200 = arith.mulf %182, %199 : vector<10x64xf32>
    %cst_122 = arith.constant dense<0.000000e+00> : vector<10x64xf32>
    %201 = tpu.matmul %198, %200, %cst_122 {dimension_numbers = #tpu.dot_dimension_numbers<[1], [0], [0], [1], [0, 0, 1, 1], [], []>} : vector<10x10xf32>, vector<10x64xf32>, vector<10x64xf32> -> vector<10x64xf32>
    %202 = arith.addf %183, %201 : vector<10x64xf32>
    %203 = vector.extract_strided_slice %3 {offsets = [1, 0], sizes = [1, 64], strides = [1, 1]} : vector<4x64xf32> to vector<1x64xf32>
    %204 = vector.broadcast %203 : vector<1x64xf32> to vector<10x64xf32>
    %205 = arith.mulf %176, %204 : vector<10x64xf32>
    %cst_123 = arith.constant dense<0.000000e+00> : vector<10x10xf32>
    %206 = tpu.matmul %205, %179, %cst_123 {dimension_numbers = #tpu.dot_dimension_numbers<[1], [1], [0], [0], [0, 0, 1, 0], [], []>} : vector<10x64xf32>, vector<10x64xf32>, vector<10x10xf32> -> vector<10x10xf32>
    %207 = arith.addf %206, %2 : vector<10x10xf32>
    %cst_124 = arith.constant dense<0xFF800000> : vector<10xf32>
    %208 = vector.multi_reduction <maximumf>, %207, %cst_124 [1] : vector<10x10xf32> to vector<10xf32>
    %209 = vector.shape_cast %208 : vector<10xf32> to vector<10x1xf32>
    %210 = vector.broadcast %209 : vector<10x1xf32> to vector<10x10xf32>
    %211 = arith.subf %207, %210 : vector<10x10xf32>
    %212 = math.exp %211 : vector<10x10xf32>
    %cst_125 = arith.constant dense<0.000000e+00> : vector<10xf32>
    %213 = vector.multi_reduction <add>, %212, %cst_125 [1] : vector<10x10xf32> to vector<10xf32>
    %214 = vector.shape_cast %213 : vector<10xf32> to vector<10x1xf32>
    %215 = tpu.reciprocal %214 {approx = true} : vector<10x1xf32> -> vector<10x1xf32>
    %216 = vector.broadcast %215 : vector<10x1xf32> to vector<10x10xf32>
    %217 = arith.mulf %212, %216 : vector<10x10xf32>
    %218 = vector.broadcast %203 : vector<1x64xf32> to vector<10x64xf32>
    %219 = arith.mulf %182, %218 : vector<10x64xf32>
    %cst_126 = arith.constant dense<0.000000e+00> : vector<10x64xf32>
    %220 = tpu.matmul %217, %219, %cst_126 {dimension_numbers = #tpu.dot_dimension_numbers<[1], [0], [0], [1], [0, 0, 1, 1], [], []>} : vector<10x10xf32>, vector<10x64xf32>, vector<10x64xf32> -> vector<10x64xf32>
    %221 = arith.addf %202, %220 : vector<10x64xf32>
    %222 = vector.extract_strided_slice %3 {offsets = [2, 0], sizes = [1, 64], strides = [1, 1]} : vector<4x64xf32> to vector<1x64xf32>
    %223 = vector.broadcast %222 : vector<1x64xf32> to vector<10x64xf32>
    %224 = arith.mulf %176, %223 : vector<10x64xf32>
    %cst_127 = arith.constant dense<0.000000e+00> : vector<10x10xf32>
    %225 = tpu.matmul %224, %179, %cst_127 {dimension_numbers = #tpu.dot_dimension_numbers<[1], [1], [0], [0], [0, 0, 1, 0], [], []>} : vector<10x64xf32>, vector<10x64xf32>, vector<10x10xf32> -> vector<10x10xf32>
    %226 = arith.addf %225, %2 : vector<10x10xf32>
    %cst_128 = arith.constant dense<0xFF800000> : vector<10xf32>
    %227 = vector.multi_reduction <maximumf>, %226, %cst_128 [1] : vector<10x10xf32> to vector<10xf32>
    %228 = vector.shape_cast %227 : vector<10xf32> to vector<10x1xf32>
    %229 = vector.broadcast %228 : vector<10x1xf32> to vector<10x10xf32>
    %230 = arith.subf %226, %229 : vector<10x10xf32>
    %231 = math.exp %230 : vector<10x10xf32>
    %cst_129 = arith.constant dense<0.000000e+00> : vector<10xf32>
    %232 = vector.multi_reduction <add>, %231, %cst_129 [1] : vector<10x10xf32> to vector<10xf32>
    %233 = vector.shape_cast %232 : vector<10xf32> to vector<10x1xf32>
    %234 = tpu.reciprocal %233 {approx = true} : vector<10x1xf32> -> vector<10x1xf32>
    %235 = vector.broadcast %234 : vector<10x1xf32> to vector<10x10xf32>
    %236 = arith.mulf %231, %235 : vector<10x10xf32>
    %237 = vector.broadcast %222 : vector<1x64xf32> to vector<10x64xf32>
    %238 = arith.mulf %182, %237 : vector<10x64xf32>
    %cst_130 = arith.constant dense<0.000000e+00> : vector<10x64xf32>
    %239 = tpu.matmul %236, %238, %cst_130 {dimension_numbers = #tpu.dot_dimension_numbers<[1], [0], [0], [1], [0, 0, 1, 1], [], []>} : vector<10x10xf32>, vector<10x64xf32>, vector<10x64xf32> -> vector<10x64xf32>
    %240 = arith.addf %221, %239 : vector<10x64xf32>
    %241 = vector.extract_strided_slice %3 {offsets = [3, 0], sizes = [1, 64], strides = [1, 1]} : vector<4x64xf32> to vector<1x64xf32>
    %242 = vector.broadcast %241 : vector<1x64xf32> to vector<10x64xf32>
    %243 = arith.mulf %176, %242 : vector<10x64xf32>
    %cst_131 = arith.constant dense<0.000000e+00> : vector<10x10xf32>
    %244 = tpu.matmul %243, %179, %cst_131 {dimension_numbers = #tpu.dot_dimension_numbers<[1], [1], [0], [0], [0, 0, 1, 0], [], []>} : vector<10x64xf32>, vector<10x64xf32>, vector<10x10xf32> -> vector<10x10xf32>
    %245 = arith.addf %244, %2 : vector<10x10xf32>
    %cst_132 = arith.constant dense<0xFF800000> : vector<10xf32>
    %246 = vector.multi_reduction <maximumf>, %245, %cst_132 [1] : vector<10x10xf32> to vector<10xf32>
    %247 = vector.shape_cast %246 : vector<10xf32> to vector<10x1xf32>
    %248 = vector.broadcast %247 : vector<10x1xf32> to vector<10x10xf32>
    %249 = arith.subf %245, %248 : vector<10x10xf32>
    %250 = math.exp %249 : vector<10x10xf32>
    %cst_133 = arith.constant dense<0.000000e+00> : vector<10xf32>
    %251 = vector.multi_reduction <add>, %250, %cst_133 [1] : vector<10x10xf32> to vector<10xf32>
    %252 = vector.shape_cast %251 : vector<10xf32> to vector<10x1xf32>
    %253 = tpu.reciprocal %252 {approx = true} : vector<10x1xf32> -> vector<10x1xf32>
    %254 = vector.broadcast %253 : vector<10x1xf32> to vector<10x10xf32>
    %255 = arith.mulf %250, %254 : vector<10x10xf32>
    %256 = vector.broadcast %241 : vector<1x64xf32> to vector<10x64xf32>
    %257 = arith.mulf %182, %256 : vector<10x64xf32>
    %cst_134 = arith.constant dense<0.000000e+00> : vector<10x64xf32>
    %258 = tpu.matmul %255, %257, %cst_134 {dimension_numbers = #tpu.dot_dimension_numbers<[1], [0], [0], [1], [0, 0, 1, 1], [], []>} : vector<10x10xf32>, vector<10x64xf32>, vector<10x64xf32> -> vector<10x64xf32>
    %259 = arith.addf %240, %258 : vector<10x64xf32>
    %cst_135 = arith.constant dense<0.000000e+00> : vector<10x64xf32>
    %260 = tpu.matmul %259, %151, %cst_135 {dimension_numbers = #tpu.dot_dimension_numbers<[1], [0], [0], [1], [0, 0, 1, 1], [], []>} : vector<10x64xf32>, vector<64x64xf32>, vector<10x64xf32> -> vector<10x64xf32>
    %261 = vector.broadcast %153 : vector<1x64xf32> to vector<10x64xf32>
    %262 = arith.addf %260, %261 : vector<10x64xf32>
    %263 = arith.addf %133, %262 : vector<10x64xf32>
    %264 = vector.extract_strided_slice %263 {offsets = [0, 0], sizes = [2, 64], strides = [1, 1]} : vector<10x64xf32> to vector<2x64xf32>
    %c0_136 = arith.constant 0 : index
    %c0_137 = arith.constant 0 : index
    %c0_138 = arith.constant 0 : index
    %265 = vector.load %arg14[%c0_136, %c0_137, %c0_138] : memref<1x2x64xf32, #tpu.memory_space<vmem>>, vector<1x2x64xf32>
    %266 = vector.shape_cast %265 : vector<1x2x64xf32> to vector<2x64xf32>
    %267 = vector.shape_cast %264 : vector<2x64xf32> to vector<1x2x64xf32>
    tpu.vector_store %arg14[%c0_136, %c0_137, %c0_138], %267 {strides = array<i32>} : memref<1x2x64xf32, #tpu.memory_space<vmem>>, vector<1x2x64xf32>,
    return
  }
  func.func @transform_0(%arg0: i32) -> (i32, i32, i32) {
    %c0_i32 = arith.constant 0 : i32
    %c0_i32_0 = arith.constant 0 : i32
    %c0_i32_1 = arith.constant 0 : i32
    return %arg0, %c0_i32, %c0_i32_0 : i32, i32, i32
  }
  func.func @transform_1(%arg0: i32) -> (i32, i32) {
    %c0_i32 = arith.constant 0 : i32
    %c0_i32_0 = arith.constant 0 : i32
    %c0_i32_1 = arith.constant 0 : i32
    return %c0_i32, %c0_i32_0 : i32, i32
  }
  func.func @transform_2(%arg0: i32) -> (i32, i32) {
    %c0_i32 = arith.constant 0 : i32
    %c0_i32_0 = arith.constant 0 : i32
    %c0_i32_1 = arith.constant 0 : i32
    return %c0_i32, %c0_i32_0 : i32, i32
  }
  func.func @transform_3(%arg0: i32) -> (i32, i32, i32, i32) {
    %c0_i32 = arith.constant 0 : i32
    %c0_i32_0 = arith.constant 0 : i32
    %c0_i32_1 = arith.constant 0 : i32
    %c0_i32_2 = arith.constant 0 : i32
    return %arg0, %c0_i32, %c0_i32_0, %c0_i32_1 : i32, i32, i32, i32
  }
  func.func @transform_4(%arg0: i32) -> (i32, i32, i32, i32) {
    %c0_i32 = arith.constant 0 : i32
    %c0_i32_0 = arith.constant 0 : i32
    %c0_i32_1 = arith.constant 0 : i32
    %c0_i32_2 = arith.constant 0 : i32
    return %arg0, %c0_i32, %c0_i32_0, %c0_i32_1 : i32, i32, i32, i32
  }
  func.func @transform_5(%arg0: i32) -> (i32, i32, i32, i32) {
    %c0_i32 = arith.constant 0 : i32
    %c0_i32_0 = arith.constant 0 : i32
    %c0_i32_1 = arith.constant 0 : i32
    %c0_i32_2 = arith.constant 0 : i32
    return %arg0, %c0_i32, %c0_i32_0, %c0_i32_1 : i32, i32, i32, i32
  }
  func.func @transform_6(%arg0: i32) -> (i32, i32, i32, i32) {
    %c0_i32 = arith.constant 0 : i32
    %c0_i32_0 = arith.constant 0 : i32
    %c0_i32_1 = arith.constant 0 : i32
    %c0_i32_2 = arith.constant 0 : i32
    return %arg0, %c0_i32, %c0_i32_0, %c0_i32_1 : i32, i32, i32, i32
  }
  func.func @transform_7(%arg0: i32) -> (i32, i32, i32, i32) {
    %c0_i32 = arith.constant 0 : i32
    %c0_i32_0 = arith.constant 0 : i32
    %c0_i32_1 = arith.constant 0 : i32
    %c0_i32_2 = arith.constant 0 : i32
    return %arg0, %c0_i32, %c0_i32_0, %c0_i32_1 : i32, i32, i32, i32
  }
  func.func @transform_8(%arg0: i32) -> (i32, i32, i32, i32) {
    %c0_i32 = arith.constant 0 : i32
    %c0_i32_0 = arith.constant 0 : i32
    %c0_i32_1 = arith.constant 0 : i32
    %c0_i32_2 = arith.constant 0 : i32
    return %arg0, %c0_i32, %c0_i32_0, %c0_i32_1 : i32, i32, i32, i32
  }
  func.func @transform_9(%arg0: i32) -> (i32, i32, i32, i32) {
    %c0_i32 = arith.constant 0 : i32
    %c0_i32_0 = arith.constant 0 : i32
    %c0_i32_1 = arith.constant 0 : i32
    %c0_i32_2 = arith.constant 0 : i32
    return %arg0, %c0_i32, %c0_i32_0, %c0_i32_1 : i32, i32, i32, i32
  }
  func.func @transform_10(%arg0: i32) -> (i32, i32, i32, i32) {
    %c0_i32 = arith.constant 0 : i32
    %c0_i32_0 = arith.constant 0 : i32
    %c0_i32_1 = arith.constant 0 : i32
    %c0_i32_2 = arith.constant 0 : i32
    return %arg0, %c0_i32, %c0_i32_0, %c0_i32_1 : i32, i32, i32, i32
  }
  func.func @transform_11(%arg0: i32) -> (i32, i32, i32, i32) {
    %c0_i32 = arith.constant 0 : i32
    %c0_i32_0 = arith.constant 0 : i32
    %c0_i32_1 = arith.constant 0 : i32
    %c0_i32_2 = arith.constant 0 : i32
    return %arg0, %c0_i32, %c0_i32_0, %c0_i32_1 : i32, i32, i32, i32
  }
  func.func @transform_12(%arg0: i32) -> (i32, i32, i32, i32) {
    %c0_i32 = arith.constant 0 : i32
    %c0_i32_0 = arith.constant 0 : i32
    %c0_i32_1 = arith.constant 0 : i32
    %c0_i32_2 = arith.constant 0 : i32
    return %arg0, %c0_i32, %c0_i32_0, %c0_i32_1 : i32, i32, i32, i32
  }
  func.func @transform_13(%arg0: i32) -> (i32, i32, i32) {
    %c0_i32 = arith.constant 0 : i32
    %c0_i32_0 = arith.constant 0 : i32
    %c0_i32_1 = arith.constant 0 : i32
    return %arg0, %c0_i32, %c0_i32_0 : i32, i32, i32
  }
}

</mosaic_0001>

<bundles_post_ra>
// kernel: tpu_custom_call.1
= control target key start
LH: loop header
LB: loop body
LE: loop exit
PB: predicated region body
PF: predicated region fallthrough
CT: control target
= control target key end

     0   :  { %s6223_s0 = inlined_call_operand.hbm [shape: f32[2,10,64], index: 0, kind: input, shape index: {}]   ;;  %s6224_s1 = inlined_call_operand.hbm [shape: f32[10,10], index: 1, kind: input, shape index: {}]   ;;  %s6225_s2 = inlined_call_operand.hbm [shape: f32[4,64], index: 2, kind: input, shape index: {}]   ;;  %s6226_s3 = inlined_call_operand.hbm [shape: f32[2,2,1,64], index: 3, kind: input, shape index: {}]   ;;  %s6227_s4 = inlined_call_operand.hbm [shape: f32[2,2,1,64], index: 4, kind: input, shape index: {}]   ;;  %s6228_s5 = inlined_call_operand.hbm [shape: f32[2,2,64,64], index: 5, kind: input, shape index: {}]   ;;  %s6229_s6 = inlined_call_operand.hbm [shape: f32[2,2,64,64], index: 6, kind: input, shape index: {}]   ;;  %s6230_s7 = inlined_call_operand.hbm [shape: f32[2,2,64,64], index: 7, kind: input, shape index: {}]   ;;  %s6231_s8 = inlined_call_operand.hbm [shape: f32[2,2,1,64], index: 8, kind: input, shape index: {}]   ;;  %s6232_s9 = inlined_call_operand.hbm [shape: f32[2,2,1,64], index: 9, kind: input, shape index: {}]   ;;  %s6233_s10 = inlined_call_operand.hbm [shape: f32[2,2,1,64], index: 10, kind: input, shape index: {}]   ;;  %s6234_s11 = inlined_call_operand.hbm [shape: f32[2,2,64,64], index: 11, kind: input, shape index: {}]   ;;  %s6235_s12 = inlined_call_operand.hbm [shape: f32[2,2,1,64], index: 12, kind: input, shape index: {}]   ;;  %s6236_s13 = inlined_call_operand.hbm [shape: f32[2,2,64], index: 13, kind: output, shape index: {}]  }
   0x1   :  { %6276 = sst [smem:[#allocation42_spill]] %s6224_s1 }
   0x2   :  { %6277 = sst [smem:[#allocation43_spill]] %s6226_s3 }
   0x3   :  { %6278 = sst [smem:[#allocation44_spill]] %s6228_s5 }
   0x4   :  { %6279 = sst [smem:[#allocation45_spill]] %s6230_s7 }
   0x5   :  { %6280 = sst [smem:[#allocation46_spill]] %s6231_s8 }
   0x6   :  { %6281 = sst [smem:[#allocation47_spill]] %s6232_s9 }
   0x7   :  { %6282 = sst [smem:[#allocation48_spill]] %s6233_s10 }
   0x8   :  { %6283 = sst [smem:[#allocation49_spill]] %s6234_s11 }
   0x9   :  { %6284 = sst [smem:[#allocation50_spill]] %s6235_s12 }
   0xa   :  { %6285 = sst [smem:[#allocation51_spill]] %s6236_s13 }
   0xb   :  { %18 = vsyncpa [#allocation3], 0 }
   0xc   :  { %20 = vsyncpa [#allocation3 + $0x1], 0 }
   0xd   :  { %21 = vsyncpa [#allocation6], 0 }
   0xe   :  { %22 = vsyncpa [#allocation9], 0 }
   0xf   :  { %24 = vsyncpa [#allocation9 + $0x1], 0 }
  0x10   :  { %25 = vsyncpa [#allocation12], 0 }
  0x11   :  { %27 = vsyncpa [#allocation12 + $0x1], 0 }
  0x12   :  { %28 = vsyncpa [#allocation15], 0 }
  0x13   :  { %30 = vsyncpa [#allocation15 + $0x1], 0 }
  0x14   :  { %31 = vsyncpa [#allocation18], 0 }
  0x15   :  { %33 = vsyncpa [#allocation18 + $0x1], 0 }
  0x16   :  { %34 = vsyncpa [#allocation21], 0 }
  0x17   :  { %36 = vsyncpa [#allocation21 + $0x1], 0 }
  0x18   :  { %37 = vsyncpa [#allocation4], 0 }
  0x19   :  { %39 = vsyncpa [#allocation4 + $0x1], 0  ;;  %s5204_s25 = smov 0   ;;  %s5206_s26 = smov 0  }
  0x1a   :  { %s5208_s27 = smov 0   ;;  %s5210_s28 = smov 0  }
  0x1b LB: > { %6286 = sst [smem:[#allocation32_spill]] %s5101_s25  ;;  %s5225_s29 = sadd.s32 4294967295, %s5113_s28   ;;  %s5113_s28 = sphi %s5210_s28, %s6348_s28   ;;  %s5109_s27 = sphi %s5208_s27, %s6351_s27   ;;  %s5105_s26 = sphi %s5206_s26, %s6350_s26   ;;  %s5101_s25 = sphi %s5204_s25, %s6349_s25  }
  0x1c   : > { %6287 = sst [smem:[#allocation33_spill]] %s5105_s26  ;;  %s3609_s30 = sadd.s32 4294967294, %s5113_s28  }
  0x1d   : > { %6288 = sst [smem:[#allocation34_spill]] %s5109_s27  ;;  %s5229_s14 = sadd.s32 1, %s5113_s28  }
  0x1e   : > { %6289 = sst [smem:[#allocation35_spill]] %s5225_s29  ;;  %s52_s15 = sadd.s32 1, %s5109_s27 }
  0x1f   : > { %6290 = sst [smem:[#allocation36_spill]] %s5229_s14  ;;  %s49_s16 = ssub.s32 %s5113_s28, %s5229_s14 }
  0x20   : > { %p59_p0 = scmp.ne.s32.totalorder %s5109_s27, %s5105_s26  ;;  %p50_p1 = scmp.eq.s32.totalorder %s49_s16, 0 }
  0x21   : > { %p60_p2 = scmp.eq.s32.totalorder %s5113_s28, 0  ;;  %p65_p3 = scmp.ne.s32.totalorder %s5105_s26, %s5101_s25 }
  0x22   : > { %p6245_p4 = scmp.eq.s32.totalorder %s5225_s29, 0  ;;  %p391_p7 = scmp.eq.s32.totalorder %s5225_s29, 1 }
  0x23   : > { %s5241_s17 = scalar_select %p50_p1, %s5109_s27, %s52_s15  }
  0x24   : > { %p5243_p5 = por %p60_p2, %p59_p0  ;;  %p5249_p6 = por %p6245_p4, %p65_p3 }
  0x25   : > { %6291 = sst [smem:[#allocation37_spill]] %s5241_s17  ;;  %p397_p8 = scmp.eq.s32.totalorder %s3609_s30, 1 }
  0x26   : > { %s6292_s18 = scalar_select %p5243_p5, 1, 0 }
  0x27   : > { %s6293_s19 = scalar_select %p5249_p6, 1, 0 }
  0x28   : > { %p3610_p9 = scmp.ge.s32.totalorder %s5113_s28, 1  ;;  %p404_p10 = scmp.lt.s32.totalorder %s5113_s28, 3 }
  0x29   : > { %6294 = sst [smem:[#allocation38_spill]] %s6293_s19  ;;  %p5256_p11 = por %p391_p7, %p59_p0 }
  0x2a   : > { %p5260_p12 = por %p397_p8, %p65_p3  ;;  %p5264_p13 = pnand %p3610_p9, %p404_p10 }
  0x2b   : > { %s6295_s20 = scalar_select %p5256_p11, 1, 0 }
  0x2c   : > { %s6297_s21 = scalar_select %p5260_p12, 1, 0 }
  0x2d   : > { %6296 = sst [smem:[#allocation39_spill]] %s6295_s20  ;;  %p4475_p1 = pneg %p5264_p13 }
  0x2e   : > { %6298 = sst [smem:[#allocation40_spill]] %s6297_s21  ;;  %s5115_s23 = smov [#allocation5]  }
  0x2f   : > { %s6299_s22 = scalar_select %p5264_p13, 1, 0 }
  0x30   : > { %s416_s24 = sshll.u32 %s5115_s23, 4  ;;  %p5272_p2 = pnand %p4475_p1, %p6245_p4  ;;  %s417_s24 = int_to_ptr.vmem [resolvable:$true] %s416_s24 }
  0x31   : > { %6300 = sst [smem:[#allocation41_spill]] %s6299_s22  ;;  %s5279_s15 = sand.u32 1, %s5109_s27  }
  0x32   : > { %s6301_s30 = scalar_select %p5272_p2, 1, 0 }
  0x33   : > { %s5282_s16 = sand.u32 1, %s5113_s28   ;;  %s6302_s1 = sld [smem:[#allocation42_spill]] }
  0x34   : > { %p6257_p8 = pneg %p5272_p2 }
  0x39   : > { %s4637_s21 = scalar_lea.hbm %s6302_s1, 256 }
  0x3a   : > { %p4638_p7 = scmp.ne.s32.totalorder %s6302_s1, %s4637_s21  ;;  %p4644_p1 = scmp.lt.u32.totalorder %s4637_s21, %s6302_s1 }
  0x3c   : > { %p4640_p9 = pnand %p6257_p8, %p4638_p7 }
  0x3e   : > { %p4641_p10 = pneg %p4640_p9 }
  0x40   : > { %p4646_p0 = pnand %p4644_p1, %p4641_p10 }
  0x42   : > { %4649 = shalt.err (!%p4646_p0)
}
  0x43   : > { %s4650_s27 = scalar_lea.vmem %s417_s24, 256  ;;  %p4658_p11 = scmp.lt.s32.totalorder %s417_s24, %s417_s24 }
  0x44   : > { %p4651_p4 = scmp.ne.s32.totalorder %s417_s24, %s4650_s27  ;;  %p4659_p6 = scmp.lt.s32.totalorder %s4650_s27, %s4650_s27 }
  0x46   : > { %p4653_p3 = pnand %p4651_p4, %p6257_p8  ;;  %p4660_p13 = por %p4659_p6, %p4658_p11 }
  0x48   : > { %p4654_p12 = pneg %p4653_p3 }
  0x4a   : > { %p4661_p5 = pnand %p4660_p13, %p4654_p12 }
  0x4c   : > { %4664 = shalt.err (!%p4661_p5)
}
  0x4d   : > { %s6253_s25 = smov 128   ;;  %s6255_s13 = smov 8  }
  0x4e   : > { %4478 = dma.hbm_to_vmem [thread:$0]  (!%p5272_p2), %s6302_s1, 256, %s417_s24, [#allocation6], %s6253_s25, %s6253_s25, %s6255_s13  }
  0x4f   : > { %p6303_p4 = scmp.ne.s32.totalorder %s6292_s18, 0  ;;  %p6304_p6 = scmp.lt.s32.totalorder %s5113_s28, 2 }
  0x50   : > { %s5318_s20 = sshll.u32 %s5279_s15, 1  ;;  %s5321_s21 = sshll.u32 %s5113_s28, 5 }
  0x51   : > { %p5313_p11 = pnand %p6304_p6, %p6303_p4  ;;  %s6306_s3 = sld [smem:[#allocation43_spill]] }
  0x52   : > { %s466_s18 = scalar_lea.vmem [#allocation8], %s5318_s20 }
  0x53   : > { %s6305_s27 = scalar_select %p5313_p11, 1, 0 }
  0x54   : > { %s473_s24 = sshll.u32 %s466_s18, 4  ;;  %p5337_p12 = pneg %p5313_p11  ;;  %s5330_s24 = int_to_ptr.vmem [resolvable:$true] %s473_s24 }
  0x56   : > { %s6307_s25 = scalar_select %p5337_p12, 1, 0 }
  0x57   : > { %s5327_s19 = scalar_lea.hbm %s6306_s3, %s5321_s21  ;;  %s4670_s13 = scalar_lea.hbm %s6306_s3, 64 }
  0x58   : > { %s4665_s17 = scalar_lea.hbm %s5327_s19, 32  ;;  %p4671_p3 = scmp.lt.u32.totalorder %s5327_s19, %s6306_s3 }
  0x59   : > { %p4666_p5 = scmp.ne.s32.totalorder %s5327_s19, %s4665_s17  ;;  %p4672_p7 = scmp.lt.u32.totalorder %s4670_s13, %s4665_s17 }
  0x5a   : > { %p4674_p10 = scmp.lt.u32.totalorder %s4665_s17, %s5327_s19 }
  0x5b   : > { %p4668_p13 = pnand %p5337_p12, %p4666_p5  ;;  %p4673_p9 = por %p4672_p7, %p4671_p3 }
  0x5d   : > { %p4669_p0 = pneg %p4668_p13  ;;  %p4675_p1 = por %p4674_p10, %p4673_p9 }
  0x5f   : > { %p4676_p4 = pnand %p4675_p1, %p4669_p0 }
  0x61   : > { %4679 = shalt.err (!%p4676_p4)
}
  0x62   : > { %s4680_s14 = scalar_lea.vmem %s5330_s24, 32  ;;  %s5118_s29 = smov [#allocation8]  }
  0x63   : > { %p4681_p6 = scmp.ne.s32.totalorder %s5330_s24, %s4680_s14  ;;  %s4685_s23 = sshll.u32 %s5118_s29, 4  ;;  %s4686_s23 = int_to_ptr.vmem [resolvable:$false] %s4685_s23 }
  0x64   : > { %s4687_s1 = scalar_lea.vmem %s4686_s23, 64  ;;  %p4688_p8 = scmp.lt.s32.totalorder %s5330_s24, %s4686_s23 }
  0x65   : > { %p4683_p5 = pnand %p4681_p6, %p5337_p12  ;;  %p4689_p2 = scmp.lt.s32.totalorder %s4687_s1, %s4680_s14 }
  0x67   : > { %p4684_p13 = pneg %p4683_p5  ;;  %p4690_p3 = por %p4689_p2, %p4688_p8 }
  0x69   : > { %p4691_p7 = pnand %p4690_p3, %p4684_p13 }
  0x6b   : > { %4694 = shalt.err (!%p4691_p7)
}
  0x6c   : > { %s6262_s13 = smov 16   ;;  %s6264_s17 = smov 1  }
  0x6d   : > { %s6308_s18 = scalar_lea.sflag [#allocation9], %s5282_s16  ;;  %s5366_s14 = sshll.u32 %s5279_s15, 7 }
  0x6e   : > { %4488 = dma.hbm_to_vmem [thread:$0]  (!%p5313_p11), %s5327_s19, 32, %s5330_s24, %s6308_s18, %s6262_s13, %s6262_s13, %s6264_s17  }
  0x6f   : > { %s5369_s29 = sshll.u32 %s5113_s28, 11  ;;  %s6309_s5 = sld [smem:[#allocation44_spill]] }
  0x70   : > { %s508_s26 = scalar_lea.vmem [#allocation11], %s5366_s14  ;;  %s6267_s19 = scalar_lea.sflag [#allocation12], %s5282_s16 }
  0x71   : > { %s515_s22 = sshll.u32 %s508_s26, 4  ;;  %s5378_s22 = int_to_ptr.vmem [resolvable:$true] %s515_s22 }
  0x75   : > { %s5375_s3 = scalar_lea.hbm %s6309_s5, %s5369_s29  ;;  %s4700_s23 = scalar_lea.hbm %s6309_s5, 4096 }
  0x76   : > { %s4695_s24 = scalar_lea.hbm %s5375_s3, 2048  ;;  %p4701_p9 = scmp.lt.u32.totalorder %s5375_s3, %s6309_s5 }
  0x77   : > { %p4696_p2 = scmp.ne.s32.totalorder %s5375_s3, %s4695_s24  ;;  %p4702_p10 = scmp.lt.u32.totalorder %s4700_s23, %s4695_s24 }
  0x78   : > { %p4704_p4 = scmp.lt.u32.totalorder %s4695_s24, %s5375_s3 }
  0x79   : > { %p4698_p8 = pnand %p4696_p2, %p5337_p12  ;;  %p4703_p1 = por %p4702_p10, %p4701_p9 }
  0x7b   : > { %p4699_p0 = pneg %p4698_p8  ;;  %p4705_p6 = por %p4704_p4, %p4703_p1 }
  0x7d   : > { %p4706_p5 = pnand %p4705_p6, %p4699_p0 }
  0x7f   : > { %4709 = shalt.err (!%p4706_p5)
}
  0x80   : > { %s4710_s26 = scalar_lea.vmem %s5378_s22, 2048  ;;  %s5121_s13 = smov [#allocation11]  }
  0x81   : > { %p4711_p13 = scmp.ne.s32.totalorder %s5378_s22, %s4710_s26  ;;  %s4715_s18 = sshll.u32 %s5121_s13, 4  ;;  %s4716_s18 = int_to_ptr.vmem [resolvable:$false] %s4715_s18 }
  0x82   : > { %s4717_s17 = scalar_lea.vmem %s4716_s18, 4096  ;;  %p4718_p2 = scmp.lt.s32.totalorder %s5378_s22, %s4716_s18 }
  0x83   : > { %p4713_p3 = pnand %p4711_p13, %p5337_p12  ;;  %p4719_p8 = scmp.lt.s32.totalorder %s4717_s17, %s4710_s26 }
  0x85   : > { %p4714_p7 = pneg %p4713_p3  ;;  %p4720_p9 = por %p4719_p8, %p4718_p2 }
  0x87   : > { %p4721_p10 = pnand %p4720_p9, %p4714_p7 }
  0x89   : > { %4724 = shalt.err (!%p4721_p10)
}
  0x8a   : > { %s6310_s24 = smov 8   ;;  %s6311_s23 = smov 128  }
  0x8b   : > { %4494 = dma.hbm_to_vmem [thread:$0]  (!%p5313_p11), %s5375_s3, 2048, %s5378_s22, %s6267_s19, %s6311_s23, %s6311_s23, %s6310_s24  }
  0x8c   : > { %s6312_s7 = sld [smem:[#allocation45_spill]]  ;;  %s550_s18 = scalar_lea.vmem [#allocation14], %s5366_s14 }
  0x8d   : > { %s557_s17 = sshll.u32 %s550_s18, 4  ;;  %s6268_s5 = scalar_lea.sflag [#allocation15], %s5282_s16  ;;  %s5414_s17 = int_to_ptr.vmem [resolvable:$true] %s557_s17 }
  0x92   : > { %s5411_s26 = scalar_lea.hbm %s6312_s7, %s5369_s29  ;;  %s4730_s1 = scalar_lea.hbm %s6312_s7, 4096 }
  0x93   : > { %s4725_s12 = scalar_lea.hbm %s5411_s26, 2048  ;;  %p4731_p6 = scmp.lt.u32.totalorder %s5411_s26, %s6312_s7 }
  0x94   : > { %p4726_p0 = scmp.ne.s32.totalorder %s5411_s26, %s4725_s12  ;;  %p4732_p5 = scmp.lt.u32.totalorder %s4730_s1, %s4725_s12 }
  0x95   : > { %p4734_p3 = scmp.lt.u32.totalorder %s4725_s12, %s5411_s26 }
  0x96   : > { %p4728_p1 = pnand %p4726_p0, %p5337_p12  ;;  %p4733_p13 = por %p4732_p5, %p4731_p6 }
  0x98   : > { %p4729_p4 = pneg %p4728_p1  ;;  %p4735_p7 = por %p4734_p3, %p4733_p13 }
  0x9a   : > { %p4736_p2 = pnand %p4735_p7, %p4729_p4 }
  0x9c   : > { %4739 = shalt.err (!%p4736_p2)
}
  0x9d   : > { %s4740_s18 = scalar_lea.vmem %s5414_s17, 2048  ;;  %s5122_s3 = smov [#allocation14]  }
  0x9e   : > { %p4741_p8 = scmp.ne.s32.totalorder %s5414_s17, %s4740_s18  ;;  %s4745_s22 = sshll.u32 %s5122_s3, 4  ;;  %s4746_s22 = int_to_ptr.vmem [resolvable:$false] %s4745_s22 }
  0x9f   : > { %s4747_s19 = scalar_lea.vmem %s4746_s22, 4096  ;;  %p4748_p0 = scmp.lt.s32.totalorder %s5414_s17, %s4746_s22 }
  0xa0   : > { %p4743_p9 = pnand %p4741_p8, %p5337_p12  ;;  %p4749_p1 = scmp.lt.s32.totalorder %s4747_s19, %s4740_s18 }
  0xa2   : > { %p4744_p10 = pneg %p4743_p9  ;;  %p4750_p6 = por %p4749_p1, %p4748_p0 }
  0xa4   : > { %p4751_p5 = pnand %p4750_p6, %p4744_p10 }
  0xa6   : > { %4754 = shalt.err (!%p4751_p5)
}
  0xa7   : > { %4500 = dma.hbm_to_vmem [thread:$0]  (!%p5313_p11), %s5411_s26, 2048, %s5414_s17, %s6268_s5, %s6311_s23, %s6311_s23, %s6310_s24  }
  0xa8   : > { %s6313_s9 = sld [smem:[#allocation47_spill]]  ;;  %s592_s18 = scalar_lea.vmem [#allocation17], %s5318_s20 }
  0xa9   : > { %s599_s3 = sshll.u32 %s592_s18, 4  ;;  %s6269_s22 = scalar_lea.sflag [#allocation18], %s5282_s16  ;;  %s5450_s3 = int_to_ptr.vmem [resolvable:$true] %s599_s3 }
  0xae   : > { %s5447_s13 = scalar_lea.hbm %s6313_s9, %s5321_s21  ;;  %s4760_s12 = scalar_lea.hbm %s6313_s9, 64 }
  0xaf   : > { %s4755_s19 = scalar_lea.hbm %s5447_s13, 32  ;;  %p4761_p7 = scmp.lt.u32.totalorder %s5447_s13, %s6313_s9 }
  0xb0   : > { %p4756_p4 = scmp.ne.s32.totalorder %s5447_s13, %s4755_s19  ;;  %p4762_p2 = scmp.lt.u32.totalorder %s4760_s12, %s4755_s19 }
  0xb1   : > { %p4764_p9 = scmp.lt.u32.totalorder %s4755_s19, %s5447_s13 }
  0xb2   : > { %p4758_p13 = pnand %p4756_p4, %p5337_p12  ;;  %p4763_p8 = por %p4762_p2, %p4761_p7 }
  0xb4   : > { %p4759_p3 = pneg %p4758_p13  ;;  %p4765_p10 = por %p4764_p9, %p4763_p8 }
  0xb6   : > { %p4766_p0 = pnand %p4765_p10, %p4759_p3 }
  0xb8   : > { %4769 = shalt.err (!%p4766_p0)
}
  0xb9   : > { %s4770_s18 = scalar_lea.vmem %s5450_s3, 32  ;;  %s5123_s26 = smov [#allocation17]  }
  0xba   : > { %p4771_p1 = scmp.ne.s32.totalorder %s5450_s3, %s4770_s18  ;;  %s4775_s17 = sshll.u32 %s5123_s26, 4  ;;  %s4776_s17 = int_to_ptr.vmem [resolvable:$false] %s4775_s17 }
  0xbb   : > { %s4777_s5 = scalar_lea.vmem %s4776_s17, 64  ;;  %p4778_p4 = scmp.lt.s32.totalorder %s5450_s3, %s4776_s17 }
  0xbc   : > { %p4773_p6 = pnand %p4771_p1, %p5337_p12  ;;  %p4779_p13 = scmp.lt.s32.totalorder %s4777_s5, %s4770_s18 }
  0xbe   : > { %p4774_p5 = pneg %p4773_p6  ;;  %p4780_p7 = por %p4779_p13, %p4778_p4 }
  0xc0   : > { %p4781_p2 = pnand %p4780_p7, %p4774_p5 }
  0xc2   : > { %4784 = shalt.err (!%p4781_p2)
}
  0xc3   : > { %s6314_s19 = smov 1   ;;  %s6315_s12 = smov 16  }
  0xc4   : > { %4506 = dma.hbm_to_vmem [thread:$0]  (!%p5313_p11), %s5447_s13, 32, %s5450_s3, %s6269_s22, %s6315_s12, %s6315_s12, %s6314_s19  }
  0xc5   : > { %s6316_s11 = sld [smem:[#allocation49_spill]]  ;;  %s634_s17 = scalar_lea.vmem [#allocation20], %s5366_s14 }
  0xc6   : > { %s641_s5 = sshll.u32 %s634_s17, 4  ;;  %s631_s7 = scalar_lea.sflag [#allocation21], %s5282_s16  ;;  %s5486_s5 = int_to_ptr.vmem [resolvable:$true] %s641_s5 }
  0xcb   : > { %s5483_s18 = scalar_lea.hbm %s6316_s11, %s5369_s29  ;;  %s4790_s1 = scalar_lea.hbm %s6316_s11, 4096 }
  0xcc   : > { %s4785_s9 = scalar_lea.hbm %s5483_s18, 2048  ;;  %p4791_p10 = scmp.lt.u32.totalorder %s5483_s18, %s6316_s11 }
  0xcd   : > { %p4786_p3 = scmp.ne.s32.totalorder %s5483_s18, %s4785_s9  ;;  %p4792_p0 = scmp.lt.u32.totalorder %s4790_s1, %s4785_s9 }
  0xce   : > { %p4794_p6 = scmp.lt.u32.totalorder %s4785_s9, %s5483_s18 }
  0xcf   : > { %p4788_p8 = pnand %p4786_p3, %p5337_p12  ;;  %p4793_p1 = por %p4792_p0, %p4791_p10 }
  0xd1   : > { %p4789_p9 = pneg %p4788_p8  ;;  %p4795_p5 = por %p4794_p6, %p4793_p1 }
  0xd3   : > { %p4796_p4 = pnand %p4795_p5, %p4789_p9 }
  0xd5   : > { %4799 = shalt.err (!%p4796_p4)
}
  0xd6   : > { %s4800_s17 = scalar_lea.vmem %s5486_s5, 2048  ;;  %s5124_s13 = smov [#allocation20]  }
  0xd7   : > { %p4801_p13 = scmp.ne.s32.totalorder %s5486_s5, %s4800_s17  ;;  %s4805_s3 = sshll.u32 %s5124_s13, 4  ;;  %s4806_s3 = int_to_ptr.vmem [resolvable:$false] %s4805_s3 }
  0xd8   : > { %s4807_s22 = scalar_lea.vmem %s4806_s3, 4096  ;;  %p4808_p3 = scmp.lt.s32.totalorder %s5486_s5, %s4806_s3 }
  0xd9   : > { %p4803_p7 = pnand %p4801_p13, %p5337_p12  ;;  %p4809_p8 = scmp.lt.s32.totalorder %s4807_s22, %s4800_s17 }
  0xdb   : > { %p4804_p2 = pneg %p4803_p7  ;;  %p4810_p10 = por %p4809_p8, %p4808_p3 }
  0xdd   : > { %p4811_p0 = pnand %p4810_p10, %p4804_p2 }
  0xdf   : > { %4814 = shalt.err (!%p4811_p0)
}
  0xe0   : > { %4512 = dma.hbm_to_vmem [thread:$0]  (!%p5313_p11), %s5483_s18, 2048, %s5486_s5, %s631_s7, %s6311_s23, %s6311_s23, %s6310_s24  }
  0xe1   : > { %s5125_s9 = smov [#allocation7]   ;;  %s3614_s26 = sshll.u32 %s5279_s15, 4 }
  0xe2   : > { %s430_s1 = sshll.u32 %s5125_s9, 4  ;;  %s4815_s3 = scalar_lea.hbm %s6225_s2, 64  ;;  %s431_s1 = int_to_ptr.vmem [resolvable:$true] %s430_s1 }
  0xe3   : > { %p4816_p9 = scmp.ne.s32.totalorder %s6225_s2, %s4815_s3  ;;  %p6317_p1 = scmp.ne.s32.totalorder %s6301_s30, 0 }
  0xe4   : > { %p4822_p13 = scmp.lt.u32.totalorder %s4815_s3, %s6225_s2 }
  0xe5   : > { %p6318_p6 = pneg %p6317_p1 }
  0xe7   : > { %p4818_p5 = pnand %p4816_p9, %p6318_p6 }
  0xe9   : > { %p4819_p4 = pneg %p4818_p5 }
  0xeb   : > { %p4824_p7 = pnand %p4822_p13, %p4819_p4 }
  0xed   : > { %4827 = shalt.err (!%p4824_p7)
}
  0xee   : > { %s4828_s18 = scalar_lea.vmem %s431_s1, 64  ;;  %p6319_p3 = pmov %p6318_p6 }
  0xef   : > { %p4829_p2 = scmp.ne.s32.totalorder %s431_s1, %s4828_s18  ;;  %p4836_p0 = scmp.lt.s32.totalorder %s431_s1, %s431_s1 }
  0xf0   : > { %p4837_p11 = scmp.lt.s32.totalorder %s4828_s18, %s4828_s18 }
  0xf1   : > { %p4831_p8 = pnand %p4829_p2, %p6319_p3 }
  0xf2   : > { %p4838_p12 = por %p4837_p11, %p4836_p0 }
  0xf3   : > { %p4832_p10 = pneg %p4831_p8 }
  0xf5   : > { %p4839_p6 = pnand %p4838_p12, %p4832_p10 }
  0xf7   : > { %4842 = shalt.err (!%p4839_p6)
}
  0xf8   : > { %4481 = dma.hbm_to_vmem [thread:$0]  (!%p6317_p1), %s6225_s2, 64, %s431_s1, [#allocation6]  }
  0xf9   : > { %s3788_s8 = sshll.u32 %s5113_s28, 8  ;;  %s445_s13 = scalar_lea.vmem [#allocation2], %s3614_s26 }
  0xfa   : > { %s5540_s17 = scalar_lea.hbm %s6223_s0, %s3788_s8  ;;  %s452_s3 = sshll.u32 %s445_s13, 4  ;;  %s5542_s3 = int_to_ptr.vmem [resolvable:$true] %s452_s3 }
  0xfb   : > { %s442_s30 = scalar_lea.sflag [#allocation3], %s5279_s15  ;;  %s4843_s22 = scalar_lea.hbm %s5540_s17, 256 }
  0xfc   : > { %p4844_p11 = scmp.ne.s32.totalorder %s5540_s17, %s4843_s22  ;;  %p6320_p12 = scmp.ne.s32.totalorder %s6307_s25, 0 }
  0xfd   : > { %s4848_s11 = scalar_lea.hbm %s6223_s0, 512  ;;  %p4849_p5 = scmp.lt.u32.totalorder %s5540_s17, %s6223_s0 }
  0xfe   : > { %p4846_p9 = pnand %p4844_p11, %p6320_p12  ;;  %p4850_p4 = scmp.lt.u32.totalorder %s4848_s11, %s4843_s22 }
  0xff   : > { %p4852_p7 = scmp.lt.u32.totalorder %s4843_s22, %s5540_s17 }
 0x100   : > { %p4847_p1 = pneg %p4846_p9  ;;  %p4851_p13 = por %p4850_p4, %p4849_p5 }
 0x102   : > { %p4853_p2 = por %p4852_p7, %p4851_p13 }
 0x104   : > { %p4854_p3 = pnand %p4853_p2, %p4847_p1 }
 0x106   : > { %4857 = shalt.err (!%p4854_p3)
}
 0x107   : > { %s4858_s26 = scalar_lea.vmem %s5542_s3, 256  ;;  %s5126_s10 = smov [#allocation2]  }
 0x108   : > { %p4859_p8 = scmp.ne.s32.totalorder %s5542_s3, %s4858_s26  ;;  %s4863_s9 = sshll.u32 %s5126_s10, 4  ;;  %s4864_s9 = int_to_ptr.vmem [resolvable:$false] %s4863_s9 }
 0x109   : > { %s4865_s13 = scalar_lea.vmem %s4864_s9, 512  ;;  %p4866_p6 = scmp.lt.s32.totalorder %s5542_s3, %s4864_s9 }
 0x10a   : > { %p4861_p10 = pnand %p4859_p8, %p6320_p12  ;;  %p4867_p11 = scmp.lt.s32.totalorder %s4865_s13, %s4858_s26 }
 0x10c   : > { %p4862_p0 = pneg %p4861_p10  ;;  %p4868_p9 = por %p4867_p11, %p4866_p6 }
 0x10e   : > { %p4869_p5 = pnand %p4868_p9, %p4862_p0 }
 0x110   : > { %4872 = shalt.err (!%p4869_p5)
}
 0x111   : > { %p6321_p1 = scmp.ne.s32.totalorder %s6305_s27, 0  ;;  %s5575_s18 = scalar_lea.hbm %s6227_s4, %s5321_s21 }
 0x112   : > { %s487_s11 = scalar_lea.vmem [#allocation10], %s5318_s20  ;;  %s4873_s15 = scalar_lea.hbm %s5575_s18, 32 }
 0x113   : > { %4485 = dma.hbm_to_vmem [thread:$0]  (!%p6321_p1), %s5540_s17, 256, %s5542_s3, %s442_s30, %s6311_s23, %s6311_s23, %s6310_s24  }
 0x114   : > { %s494_s5 = sshll.u32 %s487_s11, 4  ;;  %p4874_p4 = scmp.ne.s32.totalorder %s5575_s18, %s4873_s15  ;;  %s5578_s5 = int_to_ptr.vmem [resolvable:$true] %s494_s5 }
 0x115   : > { %s4878_s3 = scalar_lea.hbm %s6227_s4, 64  ;;  %p4879_p2 = scmp.lt.u32.totalorder %s5575_s18, %s6227_s4 }
 0x116   : > { %p4876_p13 = pnand %p4874_p4, %p6320_p12  ;;  %p4880_p3 = scmp.lt.u32.totalorder %s4878_s3, %s4873_s15 }
 0x117   : > { %p4882_p10 = scmp.lt.u32.totalorder %s4873_s15, %s5575_s18 }
 0x118   : > { %p4877_p7 = pneg %p4876_p13  ;;  %p4881_p8 = por %p4880_p3, %p4879_p2 }
 0x11a   : > { %p4883_p0 = por %p4882_p10, %p4881_p8 }
 0x11c   : > { %p4884_p6 = pnand %p4883_p0, %p4877_p7 }
 0x11e   : > { %4887 = shalt.err (!%p4884_p6)
}
 0x11f   : > { %s4888_s10 = scalar_lea.vmem %s5578_s5, 32  ;;  %s5127_s9 = smov [#allocation10]  }
 0x120   : > { %p4889_p11 = scmp.ne.s32.totalorder %s5578_s5, %s4888_s10  ;;  %s4893_s13 = sshll.u32 %s5127_s9, 4  ;;  %s4894_s13 = int_to_ptr.vmem [resolvable:$false] %s4893_s13 }
 0x121   : > { %s4895_s22 = scalar_lea.vmem %s4894_s13, 64  ;;  %p4896_p4 = scmp.lt.s32.totalorder %s5578_s5, %s4894_s13 }
 0x122   : > { %p4891_p9 = pnand %p4889_p11, %p6320_p12  ;;  %p4897_p13 = scmp.lt.s32.totalorder %s4895_s22, %s4888_s10 }
 0x124   : > { %p4892_p5 = pneg %p4891_p9  ;;  %p4898_p2 = por %p4897_p13, %p4896_p4 }
 0x126   : > { %p4899_p3 = pnand %p4898_p2, %p4892_p5 }
 0x128   : > { %4902 = shalt.err (!%p4899_p3)
}
 0x129   : > { %s6322_s1 = scalar_lea.sflag [#allocation9], %s5282_s16  ;;  %s5610_s8 = scalar_lea.hbm %s6229_s6, %s5369_s29 }
 0x12a   : > { %4491 = dma.hbm_to_vmem [thread:$0]  (!%p6321_p1), %s5575_s18, 32, %s5578_s5, %s6322_s1, %s6315_s12, %s6315_s12, %s6314_s19  }
 0x12b   : > { %s529_s17 = scalar_lea.vmem [#allocation13], %s5366_s14  ;;  %s4903_s30 = scalar_lea.hbm %s5610_s8, 2048 }
 0x12c   : > { %s536_s3 = sshll.u32 %s529_s17, 4  ;;  %p4904_p7 = scmp.ne.s32.totalorder %s5610_s8, %s4903_s30  ;;  %s5613_s3 = int_to_ptr.vmem [resolvable:$true] %s536_s3 }
 0x12d   : > { %s4908_s5 = scalar_lea.hbm %s6229_s6, 4096  ;;  %p4909_p0 = scmp.lt.u32.totalorder %s5610_s8, %s6229_s6 }
 0x12e   : > { %p4906_p8 = pnand %p4904_p7, %p6320_p12  ;;  %p4910_p6 = scmp.lt.u32.totalorder %s4908_s5, %s4903_s30 }
 0x12f   : > { %p4912_p9 = scmp.lt.u32.totalorder %s4903_s30, %s5610_s8 }
 0x130   : > { %p4907_p10 = pneg %p4906_p8  ;;  %p4911_p11 = por %p4910_p6, %p4909_p0 }
 0x132   : > { %p4913_p5 = por %p4912_p9, %p4911_p11 }
 0x134   : > { %p4914_p4 = pnand %p4913_p5, %p4907_p10 }
 0x136   : > { %4917 = shalt.err (!%p4914_p4)
}
 0x137   : > { %s4918_s14 = scalar_lea.vmem %s5613_s3, 2048  ;;  %s5128_s9 = smov [#allocation13]  }
 0x138   : > { %p4919_p13 = scmp.ne.s32.totalorder %s5613_s3, %s4918_s14  ;;  %s4923_s13 = sshll.u32 %s5128_s9, 4  ;;  %s4924_s13 = int_to_ptr.vmem [resolvable:$false] %s4923_s13 }
 0x139   : > { %s4925_s22 = scalar_lea.vmem %s4924_s13, 4096  ;;  %p4926_p7 = scmp.lt.s32.totalorder %s5613_s3, %s4924_s13 }
 0x13a   : > { %p4921_p2 = pnand %p4919_p13, %p6320_p12  ;;  %p4927_p8 = scmp.lt.s32.totalorder %s4925_s22, %s4918_s14 }
 0x13c   : > { %p4922_p3 = pneg %p4921_p2  ;;  %p4928_p0 = por %p4927_p8, %p4926_p7 }
 0x13e   : > { %p4929_p6 = pnand %p4928_p0, %p4922_p3 }
 0x140   : > { %4932 = shalt.err (!%p4929_p6)
}
 0x141   : > { %s6323_s1 = scalar_lea.sflag [#allocation12], %s5282_s16  ;;  %s6324_s17 = sld [smem:[#allocation46_spill]] }
 0x142   : > { %4497 = dma.hbm_to_vmem [thread:$0]  (!%p6321_p1), %s5610_s8, 2048, %s5613_s3, %s6323_s1, %s6311_s23, %s6311_s23, %s6310_s24  }
 0x143   : > { %s571_s26 = scalar_lea.vmem [#allocation16], %s5318_s20 }
 0x144   : > { %s578_s18 = sshll.u32 %s571_s26, 4  ;;  %s5648_s18 = int_to_ptr.vmem [resolvable:$true] %s578_s18 }
 0x147   : > { %s5645_s30 = scalar_lea.hbm %s6324_s17, %s5321_s21  ;;  %s4938_s23 = scalar_lea.hbm %s6324_s17, 64 }
 0x148   : > { %s4933_s5 = scalar_lea.hbm %s5645_s30, 32  ;;  %p4939_p5 = scmp.lt.u32.totalorder %s5645_s30, %s6324_s17 }
 0x149   : > { %p4934_p10 = scmp.ne.s32.totalorder %s5645_s30, %s4933_s5  ;;  %p4940_p4 = scmp.lt.u32.totalorder %s4938_s23, %s4933_s5 }
 0x14a   : > { %p4942_p2 = scmp.lt.u32.totalorder %s4933_s5, %s5645_s30 }
 0x14b   : > { %p4936_p11 = pnand %p4934_p10, %p6320_p12  ;;  %p4941_p13 = por %p4940_p4, %p4939_p5 }
 0x14d   : > { %p4937_p9 = pneg %p4936_p11  ;;  %p4943_p3 = por %p4942_p2, %p4941_p13 }
 0x14f   : > { %p4944_p7 = pnand %p4943_p3, %p4937_p9 }
 0x151   : > { %4947 = shalt.err (!%p4944_p7)
}
 0x152   : > { %s4948_s29 = scalar_lea.vmem %s5648_s18, 32  ;;  %s5129_s14 = smov [#allocation16]  }
 0x153   : > { %p4949_p8 = scmp.ne.s32.totalorder %s5648_s18, %s4948_s29  ;;  %s4953_s9 = sshll.u32 %s5129_s14, 4  ;;  %s4954_s9 = int_to_ptr.vmem [resolvable:$false] %s4953_s9 }
 0x154   : > { %s4955_s13 = scalar_lea.vmem %s4954_s9, 64  ;;  %p4956_p10 = scmp.lt.s32.totalorder %s5648_s18, %s4954_s9 }
 0x155   : > { %p4951_p0 = pnand %p4949_p8, %p6320_p12  ;;  %p4957_p11 = scmp.lt.s32.totalorder %s4955_s13, %s4948_s29 }
 0x157   : > { %p4952_p6 = pneg %p4951_p0  ;;  %p4958_p5 = por %p4957_p11, %p4956_p10 }
 0x159   : > { %p4959_p4 = pnand %p4958_p5, %p4952_p6 }
 0x15b   : > { %4962 = shalt.err (!%p4959_p4)
}
 0x15c   : > { %s6325_s22 = scalar_lea.sflag [#allocation15], %s5282_s16  ;;  %s6326_s15 = sld [smem:[#allocation48_spill]] }
 0x15d   : > { %4503 = dma.hbm_to_vmem [thread:$0]  (!%p6321_p1), %s5645_s30, 32, %s5648_s18, %s6325_s22, %s6315_s12, %s6315_s12, %s6314_s19  }
 0x15e   : > { %s613_s5 = scalar_lea.vmem [#allocation19], %s5318_s20 }
 0x15f   : > { %s620_s10 = sshll.u32 %s613_s5, 4  ;;  %s5683_s10 = int_to_ptr.vmem [resolvable:$true] %s620_s10 }
 0x162   : > { %s5680_s26 = scalar_lea.hbm %s6326_s15, %s5321_s21  ;;  %s4968_s18 = scalar_lea.hbm %s6326_s15, 64 }
 0x163   : > { %s4963_s24 = scalar_lea.hbm %s5680_s26, 32  ;;  %p4969_p3 = scmp.lt.u32.totalorder %s5680_s26, %s6326_s15 }
 0x164   : > { %p4964_p9 = scmp.ne.s32.totalorder %s5680_s26, %s4963_s24  ;;  %p4970_p7 = scmp.lt.u32.totalorder %s4968_s18, %s4963_s24 }
 0x165   : > { %p4972_p0 = scmp.lt.u32.totalorder %s4963_s24, %s5680_s26 }
 0x166   : > { %p4966_p13 = pnand %p4964_p9, %p6320_p12  ;;  %p4971_p8 = por %p4970_p7, %p4969_p3 }
 0x168   : > { %p4967_p2 = pneg %p4966_p13  ;;  %p4973_p6 = por %p4972_p0, %p4971_p8 }
 0x16a   : > { %p4974_p10 = pnand %p4973_p6, %p4967_p2 }
 0x16c   : > { %4977 = shalt.err (!%p4974_p10)
}
 0x16d   : > { %s4978_s29 = scalar_lea.vmem %s5683_s10, 32  ;;  %s5130_s14 = smov [#allocation19]  }
 0x16e   : > { %p4979_p11 = scmp.ne.s32.totalorder %s5683_s10, %s4978_s29  ;;  %s4983_s9 = sshll.u32 %s5130_s14, 4  ;;  %s4984_s9 = int_to_ptr.vmem [resolvable:$false] %s4983_s9 }
 0x16f   : > { %s4985_s13 = scalar_lea.vmem %s4984_s9, 64  ;;  %p4986_p9 = scmp.lt.s32.totalorder %s5683_s10, %s4984_s9 }
 0x170   : > { %p4981_p5 = pnand %p4979_p11, %p6320_p12  ;;  %p4987_p13 = scmp.lt.s32.totalorder %s4985_s13, %s4978_s29 }
 0x172   : > { %p4982_p4 = pneg %p4981_p5  ;;  %p4988_p3 = por %p4987_p13, %p4986_p9 }
 0x174   : > { %p4989_p7 = pnand %p4988_p3, %p4982_p4 }
 0x176   : > { %4992 = shalt.err (!%p4989_p7)
}
 0x177   : > { %s6327_s22 = scalar_lea.sflag [#allocation18], %s5282_s16  ;;  %s6328_s5 = sld [smem:[#allocation50_spill]] }
 0x178   : > { %4509 = dma.hbm_to_vmem [thread:$0]  (!%p6321_p1), %s5680_s26, 32, %s5683_s10, %s6327_s22, %s6315_s12, %s6315_s12, %s6314_s19  }
 0x179   : > { %s655_s23 = scalar_lea.vmem [#allocation22], %s5318_s20 }
 0x17a   : > { %s662_s30 = sshll.u32 %s655_s23, 4  ;;  %s5718_s30 = int_to_ptr.vmem [resolvable:$true] %s662_s30 }
 0x17d   : > { %s5715_s24 = scalar_lea.hbm %s6328_s5, %s5321_s21  ;;  %s4998_s10 = scalar_lea.hbm %s6328_s5, 64 }
 0x17e   : > { %s4993_s18 = scalar_lea.hbm %s5715_s24, 32  ;;  %p4999_p6 = scmp.lt.u32.totalorder %s5715_s24, %s6328_s5 }
 0x17f   : > { %p4994_p2 = scmp.ne.s32.totalorder %s5715_s24, %s4993_s18  ;;  %p5000_p10 = scmp.lt.u32.totalorder %s4998_s10, %s4993_s18 }
 0x180   : > { %p5002_p5 = scmp.lt.u32.totalorder %s4993_s18, %s5715_s24 }
 0x181   : > { %p4996_p8 = pnand %p4994_p2, %p6320_p12  ;;  %p5001_p11 = por %p5000_p10, %p4999_p6 }
 0x183   : > { %p4997_p0 = pneg %p4996_p8  ;;  %p5003_p4 = por %p5002_p5, %p5001_p11 }
 0x185   : > { %p5004_p9 = pnand %p5003_p4, %p4997_p0 }
 0x187   : > { %5007 = shalt.err (!%p5004_p9)
}
 0x188   : > { %s5008_s20 = scalar_lea.vmem %s5718_s30, 32  ;;  %s5131_s29 = smov [#allocation22]  }
 0x189   : > { %p5009_p13 = scmp.ne.s32.totalorder %s5718_s30, %s5008_s20  ;;  %s5013_s14 = sshll.u32 %s5131_s29, 4  ;;  %s5014_s14 = int_to_ptr.vmem [resolvable:$false] %s5013_s14 }
 0x18a   : > { %s5015_s9 = scalar_lea.vmem %s5014_s14, 64  ;;  %p5016_p2 = scmp.lt.s32.totalorder %s5718_s30, %s5014_s14 }
 0x18b   : > { %p5011_p3 = pnand %p5009_p13, %p6320_p12  ;;  %p5017_p8 = scmp.lt.s32.totalorder %s5015_s9, %s5008_s20 }
 0x18d   : > { %p5012_p7 = pneg %p5011_p3  ;;  %p5018_p6 = por %p5017_p8, %p5016_p2 }
 0x18f   : > { %p5019_p10 = pnand %p5018_p6, %p5012_p7 }
 0x191   : > { %5022 = shalt.err (!%p5019_p10)
}
 0x192   : > { %4515 = dma.hbm_to_vmem [thread:$0]  (!%p6321_p1), %s5715_s24, 32, %s5718_s30, %s631_s7, %s6315_s12, %s6315_s12, %s6314_s19  }
 0x193   : > { %s6329_s25 = sld [smem:[#allocation41_spill]] }
 0x199   : > { %p6330_p12 = scmp.ne.s32.totalorder %s6329_s25, 0 }
 0x19a   : > { %s6331_s13 = sld [smem:[#allocation33_spill]] (!%p6330_p12)  ;;  %s6332_s22 = sld [smem:[#allocation38_spill]] (!%p6330_p12) }
 0x19b   : > { %674 = sbr.rel (%p6330_p12) target bundleno = 3526 (0xdc6), region = 72 }
 0x1a0   : > { %s5749_s1 = sand.u32 (!%p6330_p12), 1, %s6331_s13   ;;  %p6333_p0 = scmp.ne.s32.totalorder (!%p6330_p12), %s6332_s22, 0 }
 0x1a1   : > { %s3648_s11 = sshll.u32 (!%p6330_p12), %s5749_s1, 4  ;;  %s677_s23 = scalar_lea.sflag (!%p6330_p12), [#allocation3], %s5749_s1 }
 0x1a2   : > { %s5753_s27 = scalar_lea.vmem [#allocation2], %s3648_s11 }
 0x1a3   : > { %5068 = dma.done.wait (%p6333_p0), %s677_s23, 256  }
 0x1a4   : > { %5070 = vsyncadd (%p6333_p0), %s677_s23, 4294967040  ;;  %s6334_s16 = sld [smem:[#allocation35_spill]] }
 0x1aa   : > { %p6335_p1 = scmp.eq.s32.totalorder %s6334_s16, 0 }
 0x1ac   : > { %5072 = dma.done.wait (%p6335_p1), [#allocation6], 320   ;;  %p6336_p11 = pmov %p6335_p1 }
 0x1ad   : > { %s693_s7 = sand.u32 1, %s6334_s16   ;;  %s5765_s19 = sshll.u32 %s5749_s1, 1 }
 0x1ae   : > { %5074 = vsyncadd (%p6336_p11), [#allocation6], 4294966976  ;;  %s694_s12 = scalar_lea.sflag [#allocation9], %s693_s7  ;;  %s697_s24 = scalar_lea.vmem [#allocation8], %s5765_s19 }
 0x1af   : > { %5076 = dma.done.wait (%p6333_p0), %s694_s12, 64  }
 0x1b0   : > { %5078 = vsyncadd (%p6333_p0), %s694_s12, 4294967232  ;;  %s3653_s30 = sshll.u32 %s5749_s1, 7  ;;  %s706_s18 = scalar_lea.vmem [#allocation10], %s5765_s19 }
 0x1b1   : > { %s712_s8 = scalar_lea.sflag [#allocation12], %s693_s7  ;;  %s5774_s26 = scalar_lea.vmem [#allocation11], %s3653_s30 }
 0x1b2   : > { %5080 = dma.done.wait (%p6333_p0), %s712_s8, 4096  }
 0x1b3   : > { %5082 = vsyncadd (%p6333_p0), %s712_s8, 4294963200  ;;  %s5780_s10 = scalar_lea.vmem [#allocation13], %s3653_s30  ;;  %s730_s3 = scalar_lea.sflag [#allocation15], %s693_s7 }
 0x1b4   : > { %s5782_s21 = scalar_lea.vmem [#allocation14], %s3653_s30 }
 0x1b5   : > { %5084 = dma.done.wait (%p6333_p0), %s730_s3, 2080  }
 0x1b6   : > { %5086 = vsyncadd (%p6333_p0), %s730_s3, 4294965216  ;;  %s742_s20 = scalar_lea.vmem [#allocation16], %s5765_s19  ;;  %s748_s29 = scalar_lea.sflag [#allocation18], %s693_s7 }
 0x1b7   : > { %s751_s14 = scalar_lea.vmem [#allocation17], %s5765_s19 }
 0x1b8   : > { %5088 = dma.done.wait (%p6333_p0), %s748_s29, 64  }
 0x1b9   : > { %5090 = vsyncadd (%p6333_p0), %s748_s29, 4294967232  ;;  %s760_s9 = scalar_lea.vmem [#allocation19], %s5765_s19  ;;  %s766_s25 = scalar_lea.sflag [#allocation21], %s693_s7 }
 0x1ba   : > { %s5795_s13 = scalar_lea.vmem [#allocation20], %s3653_s30 }
 0x1bb   : > { %5092 = dma.done.wait (%p6333_p0), %s766_s25, 2080  }
 0x1bc   : > { %5094 = vsyncadd (%p6333_p0), %s766_s25, 4294965216  ;;  %vm914_vm0 = vcmask 523264   ;;  %v5802_v0 = vld [vmem:[%s5753_s27] sm:$0xff]  ;;  %v5805_v1 = vld [vmem:[%s5753_s27 + $0x8] sm:$0x3]  ;;  %vm918_vm1 = vcmask 517120  }
 0x1bd   : > { %v915_v2 = vsel %vm914_vm0, %v5802_v0, 0.0  ;;  %v919_v3 = vsel %vm918_vm1, %v5805_v1, 0.0  ;;  %v878_v14 = vld [vmem:[%s5774_s26] sm:$0xff]  ;;  %v879_v15 = vld [vmem:[%s5774_s26 + $0x8] sm:$0xff]  ;;  %v880_v20 = vld [vmem:[%s5774_s26 + $0x10] sm:$0xff]  ;;  %vm1444_vm3 = vcmask 1041408  }
 0x1be   : > { %916 = vadd.xlane.f32.xlu0 %v915_v2  ;;  %v4207_v16 = vpack.c.bf16 %v879_v15, %v878_v14  ;;  %v886_v17 = vld [vmem:[%s5780_s10] sm:$0xff]  ;;  %v887_v18 = vld [vmem:[%s5780_s10 + $0x8] sm:$0xff]  ;;  %v881_v21 = vld [vmem:[%s5774_s26 + $0x18] sm:$0xff]  ;;  %vm5132_vm4 = vmmov 1   ;;  %vm1305_vm6 = vcmask 74752   ;;  %vm1301_vm7 = vcmask 80896  }
 0x1bf   : > { %v4223_v19 = vpack.c.bf16 %v887_v18, %v886_v17  ;;  %v888_v22 = vld [vmem:[%s5780_s10 + $0x10] sm:$0xff]  ;;  %v4211_v23 = vpack.c.bf16 %v881_v21, %v880_v20  ;;  %v889_v24 = vld [vmem:[%s5780_s10 + $0x18] sm:$0xff]  ;;  %v882_v25 = vld [vmem:[%s5774_s26 + $0x20] sm:$0xff]  ;;  %s778_s22 = scalar_lea.vmem [#allocation22], %s5765_s19  ;;  %s6341_s11 = sld [smem:[#allocation39_spill]] }
 0x1c0   : > { %4208 = vmatprep.subr.bf16.mxu0 %v4207_v16  ;;  %v883_v26 = vld [vmem:[%s5774_s26 + $0x28] sm:$0xff]  ;;  %v4227_v27 = vpack.c.bf16 %v889_v24, %v888_v22  ;;  %v890_v29 = vld [vmem:[%s5780_s10 + $0x20] sm:$0xff]  ;;  %v884_v32 = vld [vmem:[%s5774_s26 + $0x30] sm:$0xff]  ;;  %s3785_s23 = sshll.u32 %s6334_s16, 5  ;;  %s870_s27 = scalar_lea.vmem [#allocation23], %s5765_s19 }
 0x1c1   : > { %4210 = vmatpush3.bf16.msra.mxu0 %v4207_v16  ;;  %4224 = vmatprep.subr.bf16.mxu1 %v4223_v19  ;;  %v4215_v28 = vpack.c.bf16 %v883_v26, %v882_v25  ;;  %v891_v30 = vld [vmem:[%s5780_s10 + $0x28] sm:$0xff]  ;;  %v885_v33 = vld [vmem:[%s5774_s26 + $0x38] sm:$0xff]  ;;  %v892_v35 = vld [vmem:[%s5780_s10 + $0x30] sm:$0xff]  ;;  %s3305_s7 = sshll.u32 %s870_s27, 4  ;;  %s6342_s30 = sld [smem:[#allocation51_spill]]  ;;  %s6180_s7 = int_to_ptr.vmem [resolvable:$true] %s3305_s7 }
 0x1c2   : > { %920 = vadd.xlane.f32.xlu0 %v919_v3  ;;  %4226 = vmatpush3.bf16.msra.mxu1 %v4223_v19  ;;  %v4231_v31 = vpack.c.bf16 %v891_v30, %v890_v29  ;;  %v4219_v34 = vpack.c.bf16 %v885_v33, %v884_v32  ;;  %v893_v36 = vld [vmem:[%s5780_s10 + $0x38] sm:$0xff]  ;;  %v894_v38 = vld [vmem:[%s5782_s21] sm:$0xff]  ;;  %v895_v39 = vld [vmem:[%s5782_s21 + $0x8] sm:$0xff]  ;;  %s3292_s8 = scalar_lea.sflag [#allocation4], %s5749_s1  ;;  %s5133_s16 = smov [#allocation23]  }
 0x1c3   : > { %4212 = vmatprep.subr.bf16.mxu0 %v4211_v23  ;;  %4228 = vmatprep.subr.bf16.mxu1 %v4227_v27  ;;  %v4235_v37 = vpack.c.bf16 %v893_v36, %v892_v35  ;;  %v4239_v40 = vpack.c.bf16 %v895_v39, %v894_v38  ;;  %v3662_v48 = vld [vmem:[%s697_s24] ss:$0 sm:$0xff]  ;;  %v3663_v50 = vld [vmem:[%s706_s18] ss:$0 sm:$0xff]  ;;  %v896_v55 = vld [vmem:[%s5782_s21 + $0x10] sm:$0xff]  ;;  %s5027_s19 = sshll.u32 %s5133_s16, 4  ;;  %s5028_s19 = int_to_ptr.vmem [resolvable:$false] %s5027_s19 }
 0x1c4   : > { %v897_v56 = vld [vmem:[%s5782_s21 + $0x18] sm:$0xff]  ;;  %v898_v60 = vld [vmem:[%s5782_s21 + $0x20] sm:$0xff]  ;;  %v899_v61 = vld [vmem:[%s5782_s21 + $0x28] sm:$0xff]  ;;  %p5030_p3 = scmp.lt.s32.totalorder %s6180_s7, %s5028_s19 }
 0x1c5   : > { %4214 = vmatpush3.bf16.msra.mxu0 %v4211_v23  ;;  %v4243_v59 = vpack.c.bf16 %v897_v56, %v896_v55  ;;  %v4247_v62 = vpack.c.bf16 %v899_v61, %v898_v60  ;;  %v900_v63 = vld [vmem:[%s5782_s21 + $0x30] sm:$0xff]  ;;  %v901_v2 = vld [vmem:[%s5782_s21 + $0x38] sm:$0xff]  ;;  %vm5867_vm2 = vmpackc.low %vm914_vm0, %vm914_vm0  ;;  %p6343_p4 = scmp.ne.s32.totalorder %s6341_s11, 0 }
 0x1c6   : > { %4230 = vmatpush3.bf16.msra.mxu1 %v4227_v27  ;;  %4216 = vmatprep.subr.bf16.mxu0 %v4215_v28  ;;  %v4251_v3 = vpack.c.bf16 %v901_v2, %v900_v63  ;;  %vm5904_vm5 = vmpackc.low %vm1444_vm3, %vm5132_vm4  ;;  %v5936_v55 = vld [vmem:[#allocation5 + $0x8] sm:$0x3] }
 0x1c7   : > { %4232 = vmatprep.subr.bf16.mxu1 %v4231_v31 }
 0x1c9   : > { %4218 = vmatpush3.bf16.msra.mxu0 %v4215_v28  ;;  %v3670_v28 = vld [vmem:[%s760_s9] ss:$0 sm:$0xff] }
 0x1ca   : > { %4234 = vmatpush3.bf16.msra.mxu1 %v4231_v31  ;;  %4220 = vmatprep.subr.bf16.mxu0 %v4219_v34 }
 0x1cb   : > { %4236 = vmatprep.subr.bf16.mxu1 %v4235_v37 }
 0x1cd   : > { %4222 = vmatpush3.bf16.msra.mxu0 %v4219_v34 }
 0x1ce   : > { %4238 = vmatpush3.bf16.msra.mxu1 %v4235_v37  ;;  %4240 = vmatprep.subr.bf16.mxu0 %v4239_v40 }
 0x24b   : > { %v917_v4 = vpop.xlane.xlu0 %916 }
 0x24c   : > { %v923_v5 = vmul.f32 0.015625, %v917_v4  ;;  %v1208_v4 = vlaneseq }
 0x24e   : > { %v5812_v6 = vsub.f32 %v5802_v0, %v923_v5  ;;  %v1209_v5 = vshrl.u32 %v1208_v4, 7 }
 0x24f   : > { %v921_v7 = vpop.xlane.xlu0 %920 }
 0x250   : > { %v924_v8 = vmul.f32 0.015625, %v921_v7  ;;  %v927_v9 = vmul.f32 %v5812_v6, %v5812_v6  ;;  %v875_v7 = vld [vmem:[#allocation7] sm:$0xf]  ;;  %v1329_v21 = vsub.s32 1, %v1209_v5  ;;  %v1609_v25 = vsub.s32 2, %v1209_v5 }
 0x251   : > { %v1806_v26 = vsub.s32 3, %v1209_v5 }
 0x252   : > { %v5817_v10 = vsub.f32 %v5805_v1, %v924_v8  ;;  %v929_v11 = vsel %vm914_vm0, %v927_v9, 0.0  ;;  %v3667_v8 = vld [vmem:[%s751_s14] ss:$0 sm:$0xff]  ;;  %v3664_v9 = vld [vmem:[%s742_s20] ss:$0 sm:$0xff]  ;;  %v5879_v23 = vrot.slane %v875_v7, %v1329_v21  ;;  %v5891_v30 = vrot.slane %v875_v7, %v1609_v25 }
 0x253   : > { %930 = vadd.xlane.f32.xlu1 %v929_v11  ;;  %v5893_v31 = vrot.slane %v875_v7, %v1806_v26 }
 0x254   : > { %v928_v12 = vmul.f32 %v5817_v10, %v5817_v10 }
 0x256   : > { %v932_v13 = vsel %vm918_vm1, %v928_v12, 0.0 }
 0x257   : > { %933 = vadd.xlane.f32.xlu1 %v932_v13 }
 0x2e0   : > { %v931_v41 = vpop.xlane.xlu1 %930 }
 0x2e1   : > { %v935_v42 = vmul.f32 0.015625, %v931_v41 }
 0x2e3   : > { %v937_v43 = vadd.f32 1e-05, %v935_v42 }
 0x2e4   : > { %v934_v44 = vpop.xlane.xlu1 %933 }
 0x2e5   : > { %4565 = vrsqrt.f32 %v937_v43  ;;  %v936_v45 = vmul.f32 0.015625, %v934_v44  ;;  %v3739_v44 = vld [vmem:[%s5795_s13 + $0x70] sm:$0xff] }
 0x2e7   : > { %v938_v46 = vadd.f32 1e-05, %v936_v45 }
 0x2e9   : > { %4567 = vrsqrt.f32 %v938_v46 }
 0x2ef   : > { %v4566_v47 = vpop.eup %4565 }
 0x2f0   : > { %v941_v49 = vmul.f32 %v4566_v47, %v5812_v6  ;;  %v1210_v6 = vsub.s32 0, %v1209_v5 }
 0x2f2   : > { %v949_v51 = vmul.f32 %v3662_v48, %v941_v49  ;;  %v5863_v11 = vrot.slane %v875_v7, %v1210_v6 }
 0x2f3   : > { %v4568_v52 = vpop.eup %4567 }
 0x2f4   : > { %v942_v53 = vmul.f32 %v4568_v52, %v5817_v10  ;;  %v957_v54 = vadd.f32 %v3663_v50, %v949_v51 }
 0x2f6   : > { %v950_v57 = vmul.f32 %v3662_v48, %v942_v53  ;;  %3959 = vmatprep.mubr.msk.f32.mxu0 %vm914_vm0, %v957_v54  ;;  %3978 = vmatprep.mubr.msk.f32.mxu1 %vm914_vm0, %v957_v54 }
 0x2f8   : > { %v958_v58 = vadd.f32 %v3663_v50, %v950_v57  ;;  %v5938_v57 = vld [vmem:[#allocation5] sm:$0xff] }
 0x2fa   : > { %3960 = vmatmul.mubr.msk.f32.vlgmr.msra.gmra.mrb[0].mxu0 %vm914_vm0, %v958_v58  ;;  %3979 = vmatmul.mubr.msk.f32.vlgmr.msra.gmra.mrb[0].mxu1 %vm914_vm0, %v958_v58 }
 0x2fb   : > { %4242 = vmatpush3.bf16.msra.mxu0 %v4239_v40  ;;  %3997 = vmatprep.mubr.msk.f32.mxu0 %vm914_vm0, %v957_v54 }
 0x2fc   : > { %4244 = vmatprep.subr.bf16.mxu0 %v4243_v59 }
 0x2ff   : > { %4246 = vmatpush3.bf16.msra.mxu0 %v4243_v59 }
 0x300   : > { %4248 = vmatprep.subr.bf16.mxu0 %v4247_v62 }
 0x303   : > { %4250 = vmatpush3.bf16.msra.mxu0 %v4247_v62 }
 0x304   : > { %4252 = vmatprep.subr.bf16.mxu0 %v4251_v3 }
 0x307   : > { %4254 = vmatpush3.bf16.msra.mxu0 %v4251_v3 }
 0x30a   : > { %3998 = vmatmul.mubr.msk.f32.vlgmr.msra.gmra.mrb[2].mxu0 %vm914_vm0, %v958_v58 }
 0x3cd   : > { %v3961_v10 = vpop.f32.mrb[0].mxu0  ;;  %v3980_v12 = vpop.f32.mrb[0].mxu1 }
 0x3ce   : > { %v1124_v13 = vadd.f32 %v3980_v12, %v3667_v8  ;;  %v1037_v14 = vpop.f32.mrb[1].mxu0  ;;  %v1118_v15 = vpop.f32.mrb[1].mxu1  ;;  %v1043_v22 = vadd.f32 %v3961_v10, %v3664_v9 }
 0x3cf   : > { %v1038_v16 = vadd.f32 %v3664_v9, %v1037_v14  ;;  %v1119_v17 = vadd.f32 %v3667_v8, %v1118_v15 }
 0x3d0   : > { %v1213_v24 = vmul.f32 %v5863_v11, %v1043_v22  ;;  %v1332_v34 = vmul.f32 %v5879_v23, %v1043_v22  ;;  %v1612_v50 = vmul.f32 %v5891_v30, %v1043_v22  ;;  %v1809_v52 = vmul.f32 %v5893_v31, %v1043_v22 }
 0x3d1   : > { %v4255_v19 = vpack.c.bf16 %v1124_v13, %v1119_v17  ;;  %v1212_v20 = vmul.f32 %v5863_v11, %v1038_v16  ;;  %v1331_v27 = vmul.f32 %v5879_v23, %v1038_v16  ;;  %v1611_v45 = vmul.f32 %v5891_v30, %v1038_v16 }
 0x3d2   : > { %v1808_v51 = vmul.f32 %v5893_v31, %v1038_v16 }
 0x3d3   : > { %4257 = vmatprep.subr.msk.bf16.mxu1 %vm5867_vm2, %v4255_v19  ;;  %4004 = vmatprep.mubr.msk.f32.mxu1 %vm914_vm0, %v1212_v20 }
 0x3d4   : > { %4260 = vmatpush3.bf16.xpose.msk.msra.mxu1 %vm5867_vm2, %v4255_v19 }
 0x3d5   : > { %4263 = vmatprep.subr.msk.bf16.mxu1 %vm5867_vm2, %v4255_v19 }
 0x3db   : > { %4005 = vmatmul.mubr.msk.f32.vlgmr.msra.gmra.mrb[2].mxu1 %vm914_vm0, %v1213_v24 }
 0x3dc   : > { %4266 = vmatpush3.bf16.xpose.msk.msra.mxu1 %vm5867_vm2, %v4255_v19  ;;  %4011 = vmatprep.mubr.msk.f32.mxu1 %vm914_vm0, %v1331_v27 }
 0x3dd   : > { %v3999_v29 = vpop.f32.mrb[2].mxu0  ;;  %4281 = vmatprep.subr.msk.bf16.mxu1 %vm5867_vm2, %v4255_v19 }
 0x3de   : > { %v1205_v32 = vadd.f32 %v3999_v29, %v3670_v28  ;;  %v1199_v33 = vpop.f32.mrb[3].mxu0 }
 0x3df   : > { %v1200_v35 = vadd.f32 %v3670_v28, %v1199_v33 }
 0x3e0   : > { %v1326_v36 = vmul.f32 %v5863_v11, %v1205_v32  ;;  %v1437_v37 = vmul.f32 %v5879_v23, %v1205_v32  ;;  %v1717_v38 = vmul.f32 %v5891_v30, %v1205_v32  ;;  %v1914_v39 = vmul.f32 %v5893_v31, %v1205_v32 }
 0x3e1   : > { %v1325_v40 = vmul.f32 %v5863_v11, %v1200_v35  ;;  %v1436_v41 = vmul.f32 %v5879_v23, %v1200_v35  ;;  %v1716_v42 = vmul.f32 %v5891_v30, %v1200_v35  ;;  %v1913_v43 = vmul.f32 %v5893_v31, %v1200_v35 }
 0x3e3   : > { %4012 = vmatmul.mubr.msk.f32.vlgmr.msra.gmra.mrb[4].mxu1 %vm914_vm0, %v1332_v34  ;;  %v4267_v46 = vpack.c.bf16 %v1437_v37, %v1436_v41  ;;  %v5910_v47 = vpack.c.bf16 %v1326_v36, %v1325_v40  ;;  %v5912_v48 = vpack.c.bf16 %v1717_v38, %v1716_v42  ;;  %v5914_v49 = vpack.c.bf16 %v1914_v39, %v1913_v43 }
 0x3e4   : > { %4284 = vmatpush3.bf16.xpose.msk.msra.mxu1 %vm5867_vm2, %v4255_v19  ;;  %4032 = vmatprep.mubr.msk.f32.mxu1 %vm914_vm0, %v1611_v45 }
 0x3e5   : > { %4269 = vmatprep.subr.msk.bf16.mxu0 %vm5904_vm5, %v4267_v46  ;;  %4293 = vmatprep.subr.msk.bf16.mxu1 %vm5867_vm2, %v4255_v19 }
 0x3e6   : > { %4272 = vmatpush3.bf16.msk.msra.mxu0 %vm5904_vm5, %v4267_v46 }
 0x3e7   : > { %4275 = vmatprep.subr.msk.bf16.mxu0 %vm5904_vm5, %v5910_v47 }
 0x3eb   : > { %4033 = vmatmul.mubr.msk.f32.vlgmr.msra.gmra.mrb[6].mxu1 %vm914_vm0, %v1612_v50 }
 0x3ec   : > { %4296 = vmatpush3.bf16.xpose.msk.msra.mxu1 %vm5867_vm2, %v4255_v19  ;;  %4046 = vmatprep.mubr.msk.f32.mxu1 %vm914_vm0, %v1808_v51 }
 0x3f3   : > { %4047 = vmatmul.mubr.msk.f32.vlgmr.msra.gmra.mrb[8].mxu1 %vm914_vm0, %v1809_v52 }
 0x4ae   : > { %v4006_v53 = vpop.f32.mrb[2].mxu1 }
 0x4af   : > { %v1292_v54 = vpop.f32.mrb[3].mxu1  ;;  %v1298_v61 = vadd.f32 %v4006_v53, %v5936_v55 }
 0x4b0   : > { %v1293_v63 = vadd.f32 %v1292_v54, %v5938_v57 }
 0x4b1   : > { %v1306_v3 = vsel %vm1305_vm6, %v1298_v61, -inf }
 0x4b2   : > { %v1302_v5 = vsel %vm1301_vm7, %v1293_v63, -inf }
 0x4b6   : > { %v4013_v56 = vpop.f32.mrb[4].mxu1 }
 0x4b7   : > { %v1411_v58 = vadd.f32 %v4013_v56, %v5936_v55  ;;  %v1405_v59 = vpop.f32.mrb[5].mxu1 }
 0x4b8   : > { %v1406_v60 = vadd.f32 %v1405_v59, %v5938_v57 }
 0x4b9   : > { %v1417_v62 = vsel %vm1305_vm6, %v1411_v58, -inf }
 0x4ba   : > { %1418 = vmax.xlane.f32.xlu1 %v1417_v62  ;;  %v1414_v2 = vsel %vm1301_vm7, %v1406_v60, -inf }
 0x4bb   : > { %1415 = vmax.xlane.f32.xlu0 %v1414_v2 }
 0x4be   : > { %1307 = vmax.xlane.f32.xlu1 %v1306_v3  ;;  %v4034_v4 = vpop.f32.mrb[6].mxu1 }
 0x4bf   : > { %v1691_v6 = vadd.f32 %v4034_v4, %v5936_v55  ;;  %v1685_v7 = vpop.f32.mrb[7].mxu1  ;;  %1303 = vmax.xlane.f32.xlu0 %v1302_v5 }
 0x4c0   : > { %v1686_v8 = vadd.f32 %v1685_v7, %v5938_v57 }
 0x4c1   : > { %v1697_v9 = vsel %vm1305_vm6, %v1691_v6, -inf }
 0x4c2   : > { %1698 = vmax.xlane.f32.xlu1 %v1697_v9  ;;  %v1694_v10 = vsel %vm1301_vm7, %v1686_v8, -inf }
 0x4c3   : > { %1695 = vmax.xlane.f32.xlu0 %v1694_v10 }
 0x4c6   : > { %v4048_v12 = vpop.f32.mrb[8].mxu1 }
 0x4c7   : > { %v1888_v13 = vadd.f32 %v4048_v12, %v5936_v55  ;;  %v1882_v14 = vpop.f32.mrb[9].mxu1 }
 0x4c8   : > { %v1883_v15 = vadd.f32 %v1882_v14, %v5938_v57 }
 0x4c9   : > { %v1894_v16 = vsel %vm1305_vm6, %v1888_v13, -inf }
 0x4ca   : > { %1895 = vmax.xlane.f32.xlu1 %v1894_v16  ;;  %v1891_v17 = vsel %vm1301_vm7, %v1883_v15, -inf }
 0x4cb   : > { %1892 = vmax.xlane.f32.xlu0 %v1891_v17 }
 0x547   : > { %v1419_v19 = vpop.xlane.xlu1 %1418 }
 0x548   : > { %v1421_v20 = vsub.f32 %v1411_v58, %v1419_v19  ;;  %v1416_v21 = vpop.xlane.xlu0 %1415 }
 0x549   : > { %v1420_v22 = vsub.f32 %v1406_v60, %v1416_v21 }
 0x54a   : > { %v1424_v24 = vmul.f32 1.442695, %v1421_v20 }
 0x54b   : > { %v1422_v25 = vmul.f32 1.442695, %v1420_v22  ;;  %v1308_v26 = vpop.xlane.xlu1 %1307 }
 0x54c   : > { %4569 = vpow2.f32 %v1424_v24  ;;  %v1310_v27 = vsub.f32 %v1298_v61, %v1308_v26  ;;  %v1304_v28 = vpop.xlane.xlu0 %1303 }
 0x54d   : > { %4571 = vpow2.f32 %v1422_v25  ;;  %v1309_v29 = vsub.f32 %v1293_v63, %v1304_v28  ;;  %v906_v28 = vld [vmem:[%s5795_s13 + $0x8] sm:$0xff] }
 0x54e   : > { %v1313_v32 = vmul.f32 1.442695, %v1310_v27  ;;  %v905_v27 = vld [vmem:[%s5795_s13] sm:$0xff] }
 0x54f   : > { %v1311_v33 = vmul.f32 1.442695, %v1309_v29  ;;  %v1699_v34 = vpop.xlane.xlu1 %1698 }
 0x550   : > { %4573 = vpow2.f32 %v1313_v32  ;;  %v1701_v35 = vsub.f32 %v1691_v6, %v1699_v34  ;;  %v1696_v36 = vpop.xlane.xlu0 %1695 }
 0x551   : > { %4575 = vpow2.f32 %v1311_v33  ;;  %v1700_v37 = vsub.f32 %v1686_v8, %v1696_v36  ;;  %v4303_v33 = vpack.c.bf16 %v906_v28, %v905_v27  ;;  %v908_v36 = vld [vmem:[%s5795_s13 + $0x18] sm:$0xff]  ;;  %v3712_v27 = vld [vmem:[%s5774_s26 + $0x70] sm:$0xff]  ;;  %v3713_v28 = vld [vmem:[%s5774_s26 + $0x78] sm:$0xff] }
 0x552   : > { %v1704_v38 = vmul.f32 1.442695, %v1701_v35  ;;  %v907_v35 = vld [vmem:[%s5795_s13 + $0x10] sm:$0xff] }
 0x553   : > { %v1702_v39 = vmul.f32 1.442695, %v1700_v37 }
 0x554   : > { %4577 = vpow2.f32 %v1704_v38  ;;  %v4307_v38 = vpack.c.bf16 %v908_v36, %v907_v35  ;;  %v3723_v35 = vld [vmem:[%s5782_s21 + $0x48] sm:$0xff] }
 0x555   : > { %4579 = vpow2.f32 %v1702_v39  ;;  %v909_v39 = vld [vmem:[%s5795_s13 + $0x20] sm:$0xff] }
 0x556   : > { %v4570_v40 = vpop.eup %4569 }
 0x557   : > { %v4572_v41 = vpop.eup %4571  ;;  %v1896_v42 = vpop.xlane.xlu1 %1895  ;;  %v1429_v43 = vsel %vm1305_vm6, %v4570_v40, 0.0 }
 0x558   : > { %v1898_v45 = vsub.f32 %v1888_v13, %v1896_v42  ;;  %1430 = vadd.xlane.f32.xlu1 %v1429_v43  ;;  %v1893_v46 = vpop.xlane.xlu0 %1892  ;;  %v1426_v50 = vsel %vm1301_vm7, %v4572_v41, 0.0  ;;  %v911_v42 = vld [vmem:[%s5795_s13 + $0x30] sm:$0xff]  ;;  %v912_v43 = vld [vmem:[%s5795_s13 + $0x38] sm:$0xff] }
 0x559   : > { %v1897_v51 = vsub.f32 %v1883_v15, %v1893_v46  ;;  %1427 = vadd.xlane.f32.xlu0 %v1426_v50  ;;  %v3701_v50 = vld [vmem:[%s778_s22] ss:$0 sm:$0xff] }
 0x55a   : > { %v4574_v52 = vpop.eup %4573  ;;  %v1901_v53 = vmul.f32 1.442695, %v1898_v45 }
 0x55b   : > { %v4576_v54 = vpop.eup %4575  ;;  %v1899_v56 = vmul.f32 1.442695, %v1897_v51  ;;  %v1318_v58 = vsel %vm1305_vm6, %v4574_v52, 0.0 }
 0x55c   : > { %4581 = vpow2.f32 %v1901_v53  ;;  %1319 = vadd.xlane.f32.xlu1 %v1318_v58  ;;  %v1315_v59 = vsel %vm1301_vm7, %v4576_v54, 0.0 }
 0x55d   : > { %4583 = vpow2.f32 %v1899_v56  ;;  %1316 = vadd.xlane.f32.xlu0 %v1315_v59 }
 0x55e   : > { %v4578_v60 = vpop.eup %4577 }
 0x55f   : > { %v4580_v61 = vpop.eup %4579  ;;  %v1709_v62 = vsel %vm1305_vm6, %v4578_v60, 0.0 }
 0x560   : > { %1710 = vadd.xlane.f32.xlu1 %v1709_v62  ;;  %v1706_v63 = vsel %vm1301_vm7, %v4580_v61, 0.0 }
 0x561   : > { %1707 = vadd.xlane.f32.xlu0 %v1706_v63 }
 0x566   : > { %v4582_v2 = vpop.eup %4581 }
 0x567   : > { %v4584_v3 = vpop.eup %4583  ;;  %v1906_v4 = vsel %vm1305_vm6, %v4582_v2, 0.0 }
 0x568   : > { %1907 = vadd.xlane.f32.xlu1 %v1906_v4  ;;  %v1903_v5 = vsel %vm1301_vm7, %v4584_v3, 0.0 }
 0x569   : > { %1904 = vadd.xlane.f32.xlu0 %v1903_v5 }
 0x5e5   : > { %v1431_v6 = vpop.xlane.xlu1 %1430 }
 0x5e6   : > { %4585 = vrcp.f32 %v1431_v6  ;;  %v1428_v7 = vpop.xlane.xlu0 %1427 }
 0x5e7   : > { %4587 = vrcp.f32 %v1428_v7  ;;  %v3706_v7 = vld [vmem:[%s5774_s26 + $0x40] sm:$0xff] }
 0x5e9   : > { %v1320_v9 = vpop.xlane.xlu1 %1319 }
 0x5ea   : > { %v1317_v8 = vpop.xlane.xlu0 %1316 }
 0x5eb   : > { %4589 = vrcp.f32 %v1317_v8  ;;  %v3707_v8 = vld [vmem:[%s5774_s26 + $0x48] sm:$0xff] }
 0x5ec   : > { %4591 = vrcp.f32 %v1320_v9  ;;  %v4319_v9 = vpack.c.bf16 %v3707_v8, %v3706_v7 }
 0x5ed   : > { %v1711_v16 = vpop.xlane.xlu1 %1710 }
 0x5ee   : > { %v1708_v10 = vpop.xlane.xlu0 %1707  ;;  %4320 = vmatprep.subr.bf16.mxu1 %v4319_v9 }
 0x5ef   : > { %4593 = vrcp.f32 %v1708_v10  ;;  %v3714_v10 = vld [vmem:[%s5780_s10 + $0x40] sm:$0xff]  ;;  %4322 = vmatpush3.bf16.msra.mxu1 %v4319_v9 }
 0x5f0   : > { %v4586_v12 = vpop.eup %4585  ;;  %4595 = vrcp.f32 %v1711_v16 }
 0x5f1   : > { %v4588_v13 = vpop.eup %4587  ;;  %v1435_v15 = vmul.f32 %v4586_v12, %v4570_v40  ;;  %v910_v40 = vld [vmem:[%s5795_s13 + $0x28] sm:$0xff]  ;;  %v3715_v12 = vld [vmem:[%s5780_s10 + $0x48] sm:$0xff] }
 0x5f2   : > { %v1434_v14 = vmul.f32 %v4588_v13, %v4572_v41  ;;  %v4311_v41 = vpack.c.bf16 %v910_v40, %v909_v39  ;;  %v4335_v13 = vpack.c.bf16 %v3715_v12, %v3714_v10 }
 0x5f4   : > { %4018 = vmatprep.mubr.msk.f32.mxu0 %vm1301_vm7, %v1434_v14  ;;  %v3708_v14 = vld [vmem:[%s5774_s26 + $0x50] sm:$0xff] }
 0x5f5   : > { %v4590_v17 = vpop.eup %4589  ;;  %4019 = vmatmul.mubr.msk.f32.vlgmr.msra.gmra.mrb[4].mxu0 %vm1301_vm7, %v1435_v15  ;;  %v1908_v25 = vpop.xlane.xlu1 %1907  ;;  %v3709_v15 = vld [vmem:[%s5774_s26 + $0x58] sm:$0xff] }
 0x5f6   : > { %4278 = vmatpush3.bf16.msk.msra.mxu0 %vm5904_vm5, %v5910_v47  ;;  %v1905_v19 = vpop.xlane.xlu0 %1904  ;;  %v1323_v20 = vmul.f32 %v4590_v17, %v4576_v54  ;;  %v4592_v21 = vpop.eup %4591  ;;  %v4323_v16 = vpack.c.bf16 %v3709_v15, %v3708_v14  ;;  %v3716_v17 = vld [vmem:[%s5780_s10 + $0x50] sm:$0xff] }
 0x5f7   : > { %4287 = vmatprep.subr.msk.bf16.mxu0 %vm5904_vm5, %v5912_v48  ;;  %4597 = vrcp.f32 %v1905_v19  ;;  %v1324_v24 = vmul.f32 %v4592_v21, %v4574_v52  ;;  %v3717_v19 = vld [vmem:[%s5780_s10 + $0x58] sm:$0xff]  ;;  %v3710_v21 = vld [vmem:[%s5774_s26 + $0x60] sm:$0xff] }
 0x5f8   : > { %4025 = vmatprep.mubr.msk.f32.mxu0 %vm1301_vm7, %v1323_v20  ;;  %4599 = vrcp.f32 %v1908_v25  ;;  %v4339_v20 = vpack.c.bf16 %v3717_v19, %v3716_v17  ;;  %4324 = vmatprep.subr.bf16.mxu1 %v4323_v16  ;;  %v3718_v25 = vld [vmem:[%s5780_s10 + $0x60] sm:$0xff] }
 0x5f9   : > { %v4594_v22 = vpop.eup %4593  ;;  %4326 = vmatpush3.bf16.msra.mxu1 %v4323_v16 }
 0x5fa   : > { %v1714_v26 = vmul.f32 %v4594_v22, %v4580_v61  ;;  %v4596_v47 = vpop.eup %4595  ;;  %v3711_v22 = vld [vmem:[%s5774_s26 + $0x68] sm:$0xff]  ;;  %s5023_s26 = scalar_lea.vmem %s6180_s7, 32 }
 0x5fb   : > { %v1715_v32 = vmul.f32 %v4596_v47, %v4578_v60  ;;  %p5024_p5 = scmp.ne.s32.totalorder %s6180_s7, %s5023_s26 }
 0x5fd   : > { %4026 = vmatmul.mubr.msk.f32.vlgmr.msra.gmra.mrb[4].mxu0 %vm1301_vm7, %v1324_v24  ;;  %v4327_v24 = vpack.c.bf16 %v3711_v22, %v3710_v21  ;;  %p5025_p9 = pnand %p5024_p5, %p6343_p4 }
 0x5fe   : > { %4290 = vmatpush3.bf16.msk.msra.mxu0 %vm5904_vm5, %v5912_v48  ;;  %4039 = vmatprep.mubr.msk.f32.mxu0 %vm1301_vm7, %v1714_v26  ;;  %v3719_v26 = vld [vmem:[%s5780_s10 + $0x68] sm:$0xff] }
 0x5ff   : > { %4299 = vmatprep.subr.msk.bf16.mxu0 %vm5904_vm5, %v5914_v49  ;;  %v4343_v47 = vpack.c.bf16 %v3719_v26, %v3718_v25  ;;  %4328 = vmatprep.subr.bf16.mxu1 %v4327_v24  ;;  %p5026_p13 = pneg %p5025_p9 }
 0x600   : > { %4330 = vmatpush3.bf16.msra.mxu1 %v4327_v24 }
 0x601   : > { %v4598_v29 = vpop.eup %4597 }
 0x602   : > { %v1911_v34 = vmul.f32 %v4598_v29, %v4584_v3  ;;  %v4600_v48 = vpop.eup %4599  ;;  %v3720_v29 = vld [vmem:[%s5780_s10 + $0x70] sm:$0xff] }
 0x603   : > { %v1912_v37 = vmul.f32 %v4600_v48, %v4582_v2  ;;  %v3722_v48 = vld [vmem:[%s5782_s21 + $0x40] sm:$0xff] }
 0x604   : > { %v4351_v36 = vpack.c.bf16 %v3723_v35, %v3722_v48 }
 0x605   : > { %4040 = vmatmul.mubr.msk.f32.vlgmr.msra.gmra.mrb[4].mxu0 %vm1301_vm7, %v1715_v32  ;;  %v4331_v32 = vpack.c.bf16 %v3713_v28, %v3712_v27 }
 0x606   : > { %4302 = vmatpush3.bf16.msk.msra.mxu0 %vm5904_vm5, %v5914_v49  ;;  %4053 = vmatprep.mubr.msk.f32.mxu0 %vm1301_vm7, %v1911_v34  ;;  %v4315_v49 = vpack.c.bf16 %v912_v43, %v911_v42 }
 0x607   : > { %4304 = vmatprep.subr.bf16.mxu0 %v4303_v33  ;;  %4332 = vmatprep.subr.bf16.mxu1 %v4331_v32 }
 0x608   : > { %4334 = vmatpush3.bf16.msra.mxu1 %v4331_v32 }
 0x609   : > { %4352 = vmatprep.subr.bf16.mxu1 %v4351_v36 }
 0x60d   : > { %4054 = vmatmul.mubr.msk.f32.vlgmr.msra.gmra.mrb[4].mxu0 %vm1301_vm7, %v1912_v37 }
 0x60e   : > { %4306 = vmatpush3.bf16.msra.mxu0 %v4303_v33  ;;  %v3721_v33 = vld [vmem:[%s5780_s10 + $0x78] sm:$0xff]  ;;  %s5029_s10 = scalar_lea.vmem %s5028_s19, 64 }
 0x60f   : > { %4308 = vmatprep.subr.bf16.mxu0 %v4307_v38  ;;  %v4347_v34 = vpack.c.bf16 %v3721_v33, %v3720_v29  ;;  %p5031_p7 = scmp.lt.s32.totalorder %s5029_s10, %s5023_s26 }
 0x611   : > { %p5032_p2 = por %p5031_p7, %p5030_p3 }
 0x612   : > { %4310 = vmatpush3.bf16.msra.mxu0 %v4307_v38 }
 0x613   : > { %4312 = vmatprep.subr.bf16.mxu0 %v4311_v41  ;;  %p5033_p8 = pnand %p5032_p2, %p5026_p13 }
 0x616   : > { %4314 = vmatpush3.bf16.msra.mxu0 %v4311_v41 }
 0x617   : > { %4316 = vmatprep.subr.bf16.mxu0 %v4315_v49 }
 0x61a   : > { %4318 = vmatpush3.bf16.msra.mxu0 %v4315_v49  ;;  %v3742_v49 = vld [vmem:[%s697_s24 + $0x1] ss:$0 sm:$0xff] }
 0x61b   : > { %4336 = vmatprep.subr.bf16.mxu0 %v4335_v13 }
 0x6e0   : > { %v4055_v45 = vpop.f32.mrb[4].mxu0 }
 0x6e1   : > { %v1990_v46 = vpop.f32.mrb[5].mxu0 }
 0x6e2   : > { %4072 = vmatprep.mubr.msk.f32.mxu0 %vm914_vm0, %v1990_v46 }
 0x6e3   : > { %4073 = vmatmul.mubr.msk.f32.vlgmr.msra.gmra.mrb[6].mxu0 %vm914_vm0, %v4055_v45 }
 0x6e4   : > { %4338 = vmatpush3.bf16.msra.mxu0 %v4335_v13 }
 0x6e5   : > { %4340 = vmatprep.subr.bf16.mxu0 %v4339_v20 }
 0x6e8   : > { %4342 = vmatpush3.bf16.msra.mxu0 %v4339_v20  ;;  %v3750_v20 = vld [vmem:[%s760_s9 + $0x1] ss:$0 sm:$0xff] }
 0x6e9   : > { %4344 = vmatprep.subr.bf16.mxu0 %v4343_v47 }
 0x6ec   : > { %4346 = vmatpush3.bf16.msra.mxu0 %v4343_v47 }
 0x6ed   : > { %4348 = vmatprep.subr.bf16.mxu0 %v4347_v34 }
 0x6f0   : > { %4350 = vmatpush3.bf16.msra.mxu0 %v4347_v34 }
 0x7b6   : > { %v4074_v51 = vpop.f32.mrb[6].mxu0 }
 0x7b7   : > { %v2085_v52 = vadd.f32 %v4074_v51, %v3701_v50  ;;  %v2079_v53 = vpop.f32.mrb[7].mxu0  ;;  %v3743_v51 = vld [vmem:[%s706_s18 + $0x1] ss:$0 sm:$0xff]  ;;  %s6178_s18 = scalar_lea.hbm %s6342_s30, %s3785_s23 }
 0x7b8   : > { %v2080_v54 = vadd.f32 %v3701_v50, %v2079_v53 }
 0x7b9   : > { %v2089_v56 = vadd.f32 %v2085_v52, %v5805_v1 }
 0x7ba   : > { %v6002_v58 = vadd.f32 %v2080_v54, %v5802_v0  ;;  %v3724_v54 = vld [vmem:[%s5782_s21 + $0x50] sm:$0xff] }
 0x7bb   : > { %v2141_v59 = vsel %vm918_vm1, %v2089_v56, 0.0 }
 0x7bc   : > { %2142 = vadd.xlane.f32.xlu1 %v2141_v59  ;;  %v2138_v60 = vsel %vm914_vm0, %v6002_v58, 0.0 }
 0x7bd   : > { %2139 = vadd.xlane.f32.xlu0 %v2138_v60 }
 0x849   : > { %v2143_v61 = vpop.xlane.xlu1 %2142 }
 0x84a   : > { %v2145_v62 = vmul.f32 0.015625, %v2143_v61  ;;  %v2140_v63 = vpop.xlane.xlu0 %2139 }
 0x84b   : > { %v2144_v2 = vmul.f32 0.015625, %v2140_v63  ;;  %v3727_v63 = vld [vmem:[%s5782_s21 + $0x68] sm:$0xff] }
 0x84c   : > { %v6007_v3 = vsub.f32 %v2089_v56, %v2145_v62  ;;  %v3725_v56 = vld [vmem:[%s5782_s21 + $0x58] sm:$0xff]  ;;  %v3726_v62 = vld [vmem:[%s5782_s21 + $0x60] sm:$0xff] }
 0x84d   : > { %v6010_v0 = vsub.f32 %v6002_v58, %v2144_v2  ;;  %v4355_v61 = vpack.c.bf16 %v3725_v56, %v3724_v54  ;;  %v4359_v2 = vpack.c.bf16 %v3727_v63, %v3726_v62 }
 0x84e   : > { %v2149_v1 = vmul.f32 %v6007_v3, %v6007_v3 }
 0x84f   : > { %v2148_v4 = vmul.f32 %v6010_v0, %v6010_v0 }
 0x850   : > { %v2153_v5 = vsel %vm918_vm1, %v2149_v1, 0.0 }
 0x851   : > { %2154 = vadd.xlane.f32.xlu1 %v2153_v5  ;;  %v2150_v6 = vsel %vm914_vm0, %v2148_v4, 0.0  ;;  %v3747_v4 = vld [vmem:[%s751_s14 + $0x1] ss:$0 sm:$0xff]  ;;  %v3744_v5 = vld [vmem:[%s742_s20 + $0x1] ss:$0 sm:$0xff] }
 0x852   : > { %2151 = vadd.xlane.f32.xlu0 %v2150_v6 }
 0x8de   : > { %v2155_v37 = vpop.xlane.xlu1 %2154 }
 0x8df   : > { %v2157_v38 = vmul.f32 0.015625, %v2155_v37  ;;  %v2152_v39 = vpop.xlane.xlu0 %2151 }
 0x8e0   : > { %v2156_v40 = vmul.f32 0.015625, %v2152_v39 }
 0x8e1   : > { %v2159_v41 = vadd.f32 1e-05, %v2157_v38 }
 0x8e2   : > { %v2158_v42 = vadd.f32 1e-05, %v2156_v40 }
 0x8e3   : > { %4601 = vrsqrt.f32 %v2159_v41 }
 0x8e4   : > { %4603 = vrsqrt.f32 %v2158_v42 }
 0x8ed   : > { %v4602_v43 = vpop.eup %4601 }
 0x8ee   : > { %v4604_v45 = vpop.eup %4603  ;;  %v2163_v46 = vmul.f32 %v4602_v43, %v6007_v3  ;;  %v3728_v3 = vld [vmem:[%s5782_s21 + $0x70] sm:$0xff] }
 0x8ef   : > { %v2162_v50 = vmul.f32 %v4604_v45, %v6010_v0  ;;  %v3729_v0 = vld [vmem:[%s5782_s21 + $0x78] sm:$0xff] }
 0x8f0   : > { %v2171_v52 = vmul.f32 %v3742_v49, %v2163_v46  ;;  %v4363_v1 = vpack.c.bf16 %v3729_v0, %v3728_v3 }
 0x8f1   : > { %v2170_v53 = vmul.f32 %v3742_v49, %v2162_v50 }
 0x8f2   : > { %v2179_v60 = vadd.f32 %v3743_v51, %v2171_v52 }
 0x8f3   : > { %v2178_v59 = vadd.f32 %v3743_v51, %v2170_v53 }
 0x8f5   : > { %4091 = vmatprep.mubr.msk.f32.mxu1 %vm914_vm0, %v2178_v59  ;;  %4110 = vmatprep.mubr.msk.f32.mxu0 %vm914_vm0, %v2178_v59 }
 0x8f6   : > { %4092 = vmatmul.mubr.msk.f32.vlgmr.msra.gmra.mrb[10].mxu1 %vm914_vm0, %v2179_v60  ;;  %4111 = vmatmul.mubr.msk.f32.vlgmr.msra.gmra.mrb[8].mxu0 %vm914_vm0, %v2179_v60 }
 0x8f7   : > { %4354 = vmatpush3.bf16.msra.mxu1 %v4351_v36  ;;  %4129 = vmatprep.mubr.msk.f32.mxu1 %vm914_vm0, %v2178_v59 }
 0x8f8   : > { %4356 = vmatprep.subr.bf16.mxu1 %v4355_v61 }
 0x8fb   : > { %4358 = vmatpush3.bf16.msra.mxu1 %v4355_v61 }
 0x8fc   : > { %4360 = vmatprep.subr.bf16.mxu1 %v4359_v2 }
 0x8ff   : > { %4362 = vmatpush3.bf16.msra.mxu1 %v4359_v2 }
 0x900   : > { %4364 = vmatprep.subr.bf16.mxu1 %v4363_v1 }
 0x903   : > { %4366 = vmatpush3.bf16.msra.mxu1 %v4363_v1 }
 0x906   : > { %4130 = vmatmul.mubr.msk.f32.vlgmr.msra.gmra.mrb[12].mxu1 %vm914_vm0, %v2179_v60 }
 0x9c9   : > { %v4093_v6 = vpop.f32.mrb[10].mxu1  ;;  %v4112_v7 = vpop.f32.mrb[8].mxu0 }
 0x9ca   : > { %v2345_v8 = vadd.f32 %v4112_v7, %v3747_v4  ;;  %v2258_v9 = vpop.f32.mrb[11].mxu1  ;;  %v2339_v10 = vpop.f32.mrb[9].mxu0  ;;  %v2264_v16 = vadd.f32 %v4093_v6, %v3744_v5 }
 0x9cb   : > { %v2259_v12 = vadd.f32 %v3744_v5, %v2258_v9  ;;  %v2340_v13 = vadd.f32 %v3747_v4, %v2339_v10 }
 0x9cc   : > { %v2430_v17 = vmul.f32 %v2264_v16, %v5863_v11  ;;  %v2543_v25 = vmul.f32 %v2264_v16, %v5879_v23  ;;  %v3011_v40 = vmul.f32 %v2264_v16, %v5893_v31 }
 0x9cd   : > { %v4367_v14 = vpack.c.bf16 %v2345_v8, %v2340_v13  ;;  %v2429_v15 = vmul.f32 %v2259_v12, %v5863_v11  ;;  %v2542_v19 = vmul.f32 %v2259_v12, %v5879_v23  ;;  %v2817_v35 = vmul.f32 %v2259_v12, %v5891_v30 }
 0x9cf   : > { %4369 = vmatprep.subr.msk.bf16.mxu1 %vm5867_vm2, %v4367_v14  ;;  %4136 = vmatprep.mubr.msk.f32.mxu1 %vm914_vm0, %v2429_v15 }
 0x9d0   : > { %4372 = vmatpush3.bf16.xpose.msk.msra.mxu1 %vm5867_vm2, %v4367_v14 }
 0x9d1   : > { %4375 = vmatprep.subr.msk.bf16.mxu1 %vm5867_vm2, %v4367_v14 }
 0x9d7   : > { %4137 = vmatmul.mubr.msk.f32.vlgmr.msra.gmra.mrb[14].mxu1 %vm914_vm0, %v2430_v17 }
 0x9d8   : > { %4378 = vmatpush3.bf16.xpose.msk.msra.mxu1 %vm5867_vm2, %v4367_v14  ;;  %4143 = vmatprep.mubr.msk.f32.mxu1 %vm914_vm0, %v2542_v19 }
 0x9d9   : > { %v4131_v21 = vpop.f32.mrb[12].mxu1  ;;  %4393 = vmatprep.subr.msk.bf16.mxu1 %vm5867_vm2, %v4367_v14 }
 0x9da   : > { %v2426_v22 = vadd.f32 %v4131_v21, %v3750_v20  ;;  %v2420_v24 = vpop.f32.mrb[13].mxu1 }
 0x9db   : > { %v2421_v26 = vadd.f32 %v3750_v20, %v2420_v24 }
 0x9dc   : > { %v2541_v47 = vmul.f32 %v2426_v22, %v5863_v11  ;;  %v2648_v27 = vmul.f32 %v2426_v22, %v5879_v23  ;;  %v2923_v28 = vmul.f32 %v2426_v22, %v5891_v30  ;;  %v3116_v29 = vmul.f32 %v2426_v22, %v5893_v31 }
 0x9dd   : > { %v2540_v32 = vmul.f32 %v2421_v26, %v5863_v11  ;;  %v2647_v33 = vmul.f32 %v2421_v26, %v5879_v23  ;;  %v2922_v34 = vmul.f32 %v2421_v26, %v5891_v30  ;;  %v3115_v48 = vmul.f32 %v2421_v26, %v5893_v31 }
 0x9de   : > { %v2818_v11 = vmul.f32 %v2264_v16, %v5891_v30  ;;  %v3010_v23 = vmul.f32 %v2259_v12, %v5893_v31 }
 0x9df   : > { %4144 = vmatmul.mubr.msk.f32.vlgmr.msra.gmra.mrb[16].mxu1 %vm914_vm0, %v2543_v25  ;;  %v4379_v36 = vpack.c.bf16 %v2648_v27, %v2647_v33  ;;  %v6087_v37 = vpack.c.bf16 %v2541_v47, %v2540_v32  ;;  %v6089_v38 = vpack.c.bf16 %v2923_v28, %v2922_v34  ;;  %v6091_v39 = vpack.c.bf16 %v3116_v29, %v3115_v48 }
 0x9e0   : > { %4396 = vmatpush3.bf16.xpose.msk.msra.mxu1 %vm5867_vm2, %v4367_v14  ;;  %4164 = vmatprep.mubr.msk.f32.mxu1 %vm914_vm0, %v2817_v35 }
 0x9e1   : > { %4381 = vmatprep.subr.msk.bf16.mxu0 %vm5904_vm5, %v4379_v36  ;;  %4405 = vmatprep.subr.msk.bf16.mxu1 %vm5867_vm2, %v4367_v14 }
 0x9e2   : > { %4384 = vmatpush3.bf16.msk.msra.mxu0 %vm5904_vm5, %v4379_v36 }
 0x9e3   : > { %4387 = vmatprep.subr.msk.bf16.mxu0 %vm5904_vm5, %v6087_v37 }
 0x9e7   : > { %4165 = vmatmul.mubr.msk.f32.vlgmr.msra.gmra.mrb[18].mxu1 %vm914_vm0, %v2818_v11 }
 0x9e8   : > { %4408 = vmatpush3.bf16.xpose.msk.msra.mxu1 %vm5867_vm2, %v4367_v14  ;;  %4178 = vmatprep.mubr.msk.f32.mxu1 %vm914_vm0, %v3010_v23 }
 0x9ef   : > { %4179 = vmatmul.mubr.msk.f32.vlgmr.msra.gmra.mrb[20].mxu1 %vm914_vm0, %v3011_v40 }
 0xaaa   : > { %v4138_v41 = vpop.f32.mrb[14].mxu1 }
 0xaab   : > { %v2509_v42 = vpop.f32.mrb[15].mxu1  ;;  %v2515_v46 = vadd.f32 %v4138_v41, %v5936_v55 }
 0xaac   : > { %v2510_v18 = vadd.f32 %v2509_v42, %v5938_v57 }
 0xaad   : > { %v2521_v31 = vsel %vm1305_vm6, %v2515_v46, -inf }
 0xaae   : > { %v2518_v53 = vsel %vm1301_vm7, %v2510_v18, -inf }
 0xab2   : > { %v4145_v43 = vpop.f32.mrb[16].mxu1 }
 0xab3   : > { %v2622_v49 = vadd.f32 %v4145_v43, %v5936_v55  ;;  %v2616_v45 = vpop.f32.mrb[17].mxu1 }
 0xab4   : > { %v2617_v30 = vadd.f32 %v2616_v45, %v5938_v57 }
 0xab5   : > { %v2628_v50 = vsel %vm1305_vm6, %v2622_v49, -inf }
 0xab6   : > { %2629 = vmax.xlane.f32.xlu1 %v2628_v50  ;;  %v2625_v51 = vsel %vm1301_vm7, %v2617_v30, -inf }
 0xab7   : > { %2626 = vmax.xlane.f32.xlu0 %v2625_v51 }
 0xaba   : > { %2522 = vmax.xlane.f32.xlu1 %v2521_v31  ;;  %v4166_v52 = vpop.f32.mrb[18].mxu1 }
 0xabb   : > { %v2897_v54 = vadd.f32 %v4166_v52, %v5936_v55  ;;  %v2891_v56 = vpop.f32.mrb[19].mxu1  ;;  %2519 = vmax.xlane.f32.xlu0 %v2518_v53 }
 0xabc   : > { %v2892_v59 = vadd.f32 %v2891_v56, %v5938_v57 }
 0xabd   : > { %v2903_v60 = vsel %vm1305_vm6, %v2897_v54, -inf }
 0xabe   : > { %2904 = vmax.xlane.f32.xlu1 %v2903_v60  ;;  %v2900_v61 = vsel %vm1301_vm7, %v2892_v59, -inf }
 0xabf   : > { %2901 = vmax.xlane.f32.xlu0 %v2900_v61 }
 0xac2   : > { %v4180_v62 = vpop.f32.mrb[20].mxu1 }
 0xac3   : > { %v3090_v63 = vadd.f32 %v4180_v62, %v5936_v55  ;;  %v3084_v2 = vpop.f32.mrb[21].mxu1 }
 0xac4   : > { %v3085_v3 = vadd.f32 %v3084_v2, %v5938_v57 }
 0xac5   : > { %v3096_v0 = vsel %vm1305_vm6, %v3090_v63, -inf }
 0xac6   : > { %3097 = vmax.xlane.f32.xlu1 %v3096_v0  ;;  %v3093_v1 = vsel %vm1301_vm7, %v3085_v3, -inf }
 0xac7   : > { %3094 = vmax.xlane.f32.xlu0 %v3093_v1  ;;  %v3733_v1 = vld [vmem:[%s5795_s13 + $0x40] sm:$0xff] }
 0xb43   : > { %v2630_v4 = vpop.xlane.xlu1 %2629 }
 0xb44   : > { %v2632_v5 = vsub.f32 %v2622_v49, %v2630_v4  ;;  %v2627_v6 = vpop.xlane.xlu0 %2626  ;;  %v3734_v4 = vld [vmem:[%s5795_s13 + $0x48] sm:$0xff] }
 0xb45   : > { %v2631_v7 = vsub.f32 %v2617_v30, %v2627_v6 }
 0xb46   : > { %v2635_v8 = vmul.f32 1.442695, %v2632_v5 }
 0xb47   : > { %v2633_v9 = vmul.f32 1.442695, %v2631_v7  ;;  %v2523_v10 = vpop.xlane.xlu1 %2522  ;;  %v4415_v7 = vpack.c.bf16 %v3734_v4, %v3733_v1 }
 0xb48   : > { %4605 = vpow2.f32 %v2635_v8  ;;  %v2525_v12 = vsub.f32 %v2515_v46, %v2523_v10  ;;  %v2520_v13 = vpop.xlane.xlu0 %2519  ;;  %v3736_v10 = vld [vmem:[%s5795_s13 + $0x58] sm:$0xff] }
 0xb49   : > { %4607 = vpow2.f32 %v2633_v9  ;;  %v2524_v55 = vsub.f32 %v2510_v18, %v2520_v13  ;;  %v3735_v9 = vld [vmem:[%s5795_s13 + $0x50] sm:$0xff] }
 0xb4a   : > { %v2528_v14 = vmul.f32 1.442695, %v2525_v12  ;;  %v4419_v13 = vpack.c.bf16 %v3736_v10, %v3735_v9 }
 0xb4b   : > { %v2526_v57 = vmul.f32 1.442695, %v2524_v55  ;;  %v2905_v15 = vpop.xlane.xlu1 %2904  ;;  %v3737_v55 = vld [vmem:[%s5795_s13 + $0x60] sm:$0xff] }
 0xb4c   : > { %4609 = vpow2.f32 %v2528_v14  ;;  %v2907_v16 = vsub.f32 %v2897_v54, %v2905_v15  ;;  %v2902_v17 = vpop.xlane.xlu0 %2901  ;;  %v3738_v14 = vld [vmem:[%s5795_s13 + $0x68] sm:$0xff] }
 0xb4d   : > { %4611 = vpow2.f32 %v2526_v57  ;;  %v2906_v19 = vsub.f32 %v2892_v59, %v2902_v17  ;;  %v4423_v57 = vpack.c.bf16 %v3738_v14, %v3737_v55 }
 0xb4e   : > { %v2910_v20 = vmul.f32 1.442695, %v2907_v16 }
 0xb4f   : > { %v2908_v21 = vmul.f32 1.442695, %v2906_v19  ;;  %v3781_v19 = vld [vmem:[%s778_s22 + $0x1] ss:$0 sm:$0xff] }
 0xb50   : > { %4613 = vpow2.f32 %v2910_v20 }
 0xb51   : > { %4615 = vpow2.f32 %v2908_v21 }
 0xb52   : > { %v4606_v22 = vpop.eup %4605 }
 0xb53   : > { %v4608_v24 = vpop.eup %4607  ;;  %v3098_v25 = vpop.xlane.xlu1 %3097  ;;  %v2640_v26 = vsel %vm1305_vm6, %v4606_v22, 0.0 }
 0xb54   : > { %v3100_v47 = vsub.f32 %v3090_v63, %v3098_v25  ;;  %2641 = vadd.xlane.f32.xlu1 %v2640_v26  ;;  %v3095_v27 = vpop.xlane.xlu0 %3094  ;;  %v2637_v28 = vsel %vm1301_vm7, %v4608_v24, 0.0 }
 0xb55   : > { %v3099_v29 = vsub.f32 %v3085_v3, %v3095_v27  ;;  %2638 = vadd.xlane.f32.xlu0 %v2637_v28 }
 0xb56   : > { %v4610_v32 = vpop.eup %4609  ;;  %v3103_v33 = vmul.f32 1.442695, %v3100_v47 }
 0xb57   : > { %v4612_v34 = vpop.eup %4611  ;;  %v3101_v48 = vmul.f32 1.442695, %v3099_v29  ;;  %v2533_v35 = vsel %vm1305_vm6, %v4610_v32, 0.0 }
 0xb58   : > { %4617 = vpow2.f32 %v3103_v33  ;;  %2534 = vadd.xlane.f32.xlu1 %v2533_v35  ;;  %v2530_v36 = vsel %vm1301_vm7, %v4612_v34, 0.0 }
 0xb59   : > { %4619 = vpow2.f32 %v3101_v48  ;;  %2531 = vadd.xlane.f32.xlu0 %v2530_v36 }
 0xb5a   : > { %v4614_v11 = vpop.eup %4613 }
 0xb5b   : > { %v4616_v23 = vpop.eup %4615  ;;  %v2915_v40 = vsel %vm1305_vm6, %v4614_v11, 0.0 }
 0xb5c   : > { %2916 = vadd.xlane.f32.xlu1 %v2915_v40  ;;  %v2912_v41 = vsel %vm1301_vm7, %v4616_v23, 0.0 }
 0xb5d   : > { %2913 = vadd.xlane.f32.xlu0 %v2912_v41 }
 0xb62   : > { %v4618_v42 = vpop.eup %4617 }
 0xb63   : > { %v4620_v43 = vpop.eup %4619  ;;  %v3108_v49 = vsel %vm1305_vm6, %v4618_v42, 0.0 }
 0xb64   : > { %3109 = vadd.xlane.f32.xlu1 %v3108_v49  ;;  %v3105_v45 = vsel %vm1301_vm7, %v4620_v43, 0.0 }
 0xb65   : > { %3106 = vadd.xlane.f32.xlu0 %v3105_v45 }
 0xbe1   : > { %v2642_v30 = vpop.xlane.xlu1 %2641 }
 0xbe2   : > { %4621 = vrcp.f32 %v2642_v30  ;;  %v2639_v46 = vpop.xlane.xlu0 %2638 }
 0xbe3   : > { %4623 = vrcp.f32 %v2639_v46 }
 0xbe5   : > { %v2535_v18 = vpop.xlane.xlu1 %2534 }
 0xbe6   : > { %v2532_v50 = vpop.xlane.xlu0 %2531 }
 0xbe7   : > { %4625 = vrcp.f32 %v2532_v50 }
 0xbe8   : > { %4627 = vrcp.f32 %v2535_v18 }
 0xbe9   : > { %v2917_v56 = vpop.xlane.xlu1 %2916 }
 0xbea   : > { %v2914_v51 = vpop.xlane.xlu0 %2913 }
 0xbeb   : > { %4629 = vrcp.f32 %v2914_v51 }
 0xbec   : > { %v4622_v31 = vpop.eup %4621  ;;  %4631 = vrcp.f32 %v2917_v56 }
 0xbed   : > { %v4624_v52 = vpop.eup %4623  ;;  %v2646_v54 = vmul.f32 %v4622_v31, %v4606_v22 }
 0xbee   : > { %v2645_v53 = vmul.f32 %v4624_v52, %v4608_v24 }
 0xbf0   : > { %4150 = vmatprep.mubr.msk.f32.mxu0 %vm1301_vm7, %v2645_v53 }
 0xbf1   : > { %v4626_v59 = vpop.eup %4625  ;;  %4151 = vmatmul.mubr.msk.f32.vlgmr.msra.gmra.mrb[10].mxu0 %vm1301_vm7, %v2646_v54  ;;  %v3110_v3 = vpop.xlane.xlu1 %3109 }
 0xbf2   : > { %4390 = vmatpush3.bf16.msk.msra.mxu0 %vm5904_vm5, %v6087_v37  ;;  %v3107_v60 = vpop.xlane.xlu0 %3106  ;;  %v2538_v61 = vmul.f32 %v4626_v59, %v4612_v34  ;;  %v4628_v62 = vpop.eup %4627 }
 0xbf3   : > { %4399 = vmatprep.subr.msk.bf16.mxu0 %vm5904_vm5, %v6089_v38  ;;  %4633 = vrcp.f32 %v3107_v60  ;;  %v2539_v2 = vmul.f32 %v4628_v62, %v4610_v32 }
 0xbf4   : > { %4157 = vmatprep.mubr.msk.f32.mxu0 %vm1301_vm7, %v2538_v61  ;;  %4635 = vrcp.f32 %v3110_v3 }
 0xbf5   : > { %v4630_v63 = vpop.eup %4629 }
 0xbf6   : > { %v2920_v0 = vmul.f32 %v4630_v63, %v4616_v23  ;;  %v4632_v37 = vpop.eup %4631 }
 0xbf7   : > { %v2921_v6 = vmul.f32 %v4632_v37, %v4614_v11 }
 0xbf9   : > { %4158 = vmatmul.mubr.msk.f32.vlgmr.msra.gmra.mrb[10].mxu0 %vm1301_vm7, %v2539_v2 }
 0xbfa   : > { %4402 = vmatpush3.bf16.msk.msra.mxu0 %vm5904_vm5, %v6089_v38  ;;  %4171 = vmatprep.mubr.msk.f32.mxu0 %vm1301_vm7, %v2920_v0 }
 0xbfb   : > { %4411 = vmatprep.subr.msk.bf16.mxu0 %vm5904_vm5, %v6091_v39 }
 0xbfd   : > { %v4634_v5 = vpop.eup %4633 }
 0xbfe   : > { %v3113_v8 = vmul.f32 %v4634_v5, %v4620_v43  ;;  %v4636_v38 = vpop.eup %4635 }
 0xbff   : > { %v3114_v12 = vmul.f32 %v4636_v38, %v4618_v42 }
 0xc01   : > { %4172 = vmatmul.mubr.msk.f32.vlgmr.msra.gmra.mrb[10].mxu0 %vm1301_vm7, %v2921_v6 }
 0xc02   : > { %4414 = vmatpush3.bf16.msk.msra.mxu0 %vm5904_vm5, %v6091_v39  ;;  %4185 = vmatprep.mubr.msk.f32.mxu0 %vm1301_vm7, %v3113_v8  ;;  %v3740_v39 = vld [vmem:[%s5795_s13 + $0x78] sm:$0xff] }
 0xc03   : > { %4416 = vmatprep.subr.bf16.mxu0 %v4415_v7  ;;  %v4427_v15 = vpack.c.bf16 %v3740_v39, %v3739_v44 }
 0xc09   : > { %4186 = vmatmul.mubr.msk.f32.vlgmr.msra.gmra.mrb[10].mxu0 %vm1301_vm7, %v3114_v12 }
 0xc0a   : > { %4418 = vmatpush3.bf16.msra.mxu0 %v4415_v7 }
 0xc0b   : > { %4420 = vmatprep.subr.bf16.mxu0 %v4419_v13 }
 0xc0e   : > { %4422 = vmatpush3.bf16.msra.mxu0 %v4419_v13 }
 0xc0f   : > { %4424 = vmatprep.subr.bf16.mxu0 %v4423_v57 }
 0xc12   : > { %4426 = vmatpush3.bf16.msra.mxu0 %v4423_v57 }
 0xc13   : > { %4428 = vmatprep.subr.bf16.mxu0 %v4427_v15 }
 0xc16   : > { %4430 = vmatpush3.bf16.msra.mxu0 %v4427_v15 }
 0xcdc   : > { %v4187_v16 = vpop.f32.mrb[10].mxu0 }
 0xcdd   : > { %v3192_v17 = vpop.f32.mrb[11].mxu0 }
 0xcde   : > { %4204 = vmatprep.mubr.msk.f32.mxu0 %vm914_vm0, %v3192_v17 }
 0xcdf   : > { %4205 = vmatmul.mubr.msk.f32.vlgmr.msra.gmra.mrb[12].mxu0 %vm914_vm0, %v4187_v16 }
 0xdb2   : > { %v4206_v20 = vpop.f32.mrb[12].mxu0 }
 0xdb3   : > { %v3281_v21 = vpop.f32.mrb[13].mxu0 }
 0xdb4   : > { %v3282_v22 = vadd.f32 %v3781_v19, %v3281_v21 }
 0xdb6   : > { %v3289_v24 = vadd.f32 %v3282_v22, %v6002_v58 }
 0xdb8   : > { %3290 = vst.msk [vmem:[%s870_s27] sm:$0x3] %vm918_vm1, %v3289_v24 }
 0xdb9   : > { %5036 = shalt.err (!%p5033_p8)
}
 0xdba   : > { %s5037_s1 = scalar_lea.hbm %s6178_s18, 32  ;;  %s5041_s20 = scalar_lea.hbm %s6342_s30, 64 }
 0xdbb   : > { %p5038_p6 = scmp.ne.s32.totalorder %s6178_s18, %s5037_s1  ;;  %p5042_p0 = scmp.lt.u32.totalorder %s6178_s18, %s6342_s30 }
 0xdbc   : > { %p5043_p1 = scmp.lt.u32.totalorder %s5041_s20, %s5037_s1  ;;  %p5045_p5 = scmp.lt.u32.totalorder %s5037_s1, %s6178_s18 }
 0xdbd   : > { %p5039_p10 = pnand %p5038_p6, %p6343_p4 }
 0xdbe   : > { %p5044_p11 = por %p5043_p1, %p5042_p0 }
 0xdbf   : > { %p5040_p12 = pneg %p5039_p10 }
 0xdc0   : > { %p5046_p9 = por %p5045_p5, %p5044_p11 }
 0xdc2   : > { %p5047_p13 = pnand %p5046_p9, %p5040_p12 }
 0xdc4   : > { %5050 = shalt.err (!%p5047_p13)
}
 0xdc5   : > { %4473 = dma.vmem_to_hbm [thread:$0]  (%p6343_p4), %s6180_s7, 32, %s6178_s18, %s3292_s8  }
 0xdc6 PF: > { %s6344_s9 = sld [smem:[#allocation32_spill]]  ;;  %s6345_s25 = sld [smem:[#allocation40_spill]] }
 0xdc7   : > { %p6347_p7 = scmp.ge.s32.totalorder %s5113_s28, 2 }
 0xdcc   : > { %s3317_s13 = sand.u32 1, %s6344_s9   ;;  %p6346_p3 = scmp.ne.s32.totalorder %s6345_s25, 0 }
 0xdcd   : > { %s3318_s22 = scalar_lea.sflag [#allocation4], %s3317_s13 }
 0xdce   : > { %p4517_p2 = pnand %p6347_p7, %p6346_p3 }
 0xdd0   : > { %5096 = dma.done.wait (!%p4517_p2), %s3318_s22, 32  }
 0xdd1   : > { %5098 = vsyncadd (!%p4517_p2), %s3318_s22, 4294967264  ;;  %s6348_s28 = sld [smem:[#allocation36_spill]]  ;;  %s6349_s25 = sld [smem:[#allocation33_spill]] }
 0xdd2   : > { %s6350_s26 = sld [smem:[#allocation34_spill]]  ;;  %s6351_s27 = sld [smem:[#allocation37_spill]] }
 0xdd7   : > { %p42_p8 = scmp.ge.s32.totalorder %s6348_s28, 4  }
 0xdd9   :  { %44 = sbr.rel (!%p42_p8) target bundleno = 27 (0x1b), region = 255 }
 0xde0   :  { %3323 = vsyncpa [#allocation3], 1 }
 0xde1   :  { %3325 = vsyncpa [#allocation3 + $0x1], 1 }
 0xde2   :  { %3326 = vsyncpa [#allocation6], 1 }
 0xde3   :  { %3327 = vsyncpa [#allocation9], 1 }
 0xde4   :  { %3329 = vsyncpa [#allocation9 + $0x1], 1 }
 0xde5   :  { %3330 = vsyncpa [#allocation12], 1 }
 0xde6   :  { %3332 = vsyncpa [#allocation12 + $0x1], 1 }
 0xde7   :  { %3333 = vsyncpa [#allocation15], 1 }
 0xde8   :  { %3335 = vsyncpa [#allocation15 + $0x1], 1 }
 0xde9   :  { %3336 = vsyncpa [#allocation18], 1 }
 0xdea   :  { %3338 = vsyncpa [#allocation18 + $0x1], 1 }
 0xdeb   :  { %3339 = vsyncpa [#allocation21], 1 }
 0xdec   :  { %3341 = vsyncpa [#allocation21 + $0x1], 1 }
 0xded   :  { %3342 = vsyncpa [#allocation4], 1 }
 0xdee   :  { %3344 = vsyncpa [#allocation4 + $0x1], 1 }

</bundles_post_ra>
